<compile_context>
chip_gen: v5e
topology: v5e:2x2
jax: 0.10.0
libtpu: 0.0.40
codegen_flags: <defaults>
</compile_context>

<pallas_src>
import jax
import jax.numpy as jnp
from jax import lax
from jax.experimental import pallas as pl
from jax.experimental.pallas import tpu as pltpu

NEG_SLOPE = 0.01          # F.leaky_relu default
IN_FEATURES = 329
FUSED_WIDTH = 128         # lanes of the fused first-layer output slab
CHAMP1 = 50               # champ_fc1 out features   -> lanes [0, 50)
FC1_OUT = 32              # fc1 out features          -> lanes [50, 82)
FC1_LO = CHAMP1
FC1_HI = CHAMP1 + FC1_OUT
CHAMP2 = 20               # champ_fc2 out features


def _leaky_relu(v):
    return jnp.where(v > 0, v, NEG_SLOPE * v)


def net_kernel(x_ref, wf_ref, w2_ref, w3b_ref, w4t_ref, b4_ref, o_ref):
    x = x_ref[...]                                                       # (tb, 329)

    # One fused K=329 pass over x:
    #   lanes [0,50)  : x[:,1:305] @ W1                (champ_fc1 pre-activation)
    #   lanes [50,82) : x[:,0:1], x[:,305:] part of fc1 pre-activation
    #   lanes [82,128): zero
    y = jnp.dot(x, wf_ref[...], preferred_element_type=jnp.float32)      # (tb, 128)

    # champ branch.  Activating all 128 lanes is harmless: rows >= 50 of the
    # padded W2 are zero, so non-champ lanes cannot contaminate c2.
    c = _leaky_relu(y)
    c2 = _leaky_relu(jnp.dot(c, w2_ref[...],
                             preferred_element_type=jnp.float32))        # (tb, 20)

    # fc1: the champ contribution (1/500000 folded into w3b) lands on lanes
    # [50,82) of a 128-wide slab and is added to the raw y (whose lanes
    # [50,82) already hold the x[:,0:1] / x[:,305:] contribution).  Lanes
    # outside [50,82) become garbage but are zeroed by w4's padded columns.
    h = _leaky_relu(y + jnp.dot(c2, w3b_ref[...],
                                preferred_element_type=jnp.float32))     # (tb, 128)

    # TODO(synk): nn.Dropout(0.2) is the identity in eval mode; training-mode
    # stochastic dropout intentionally not applied here.

    # fc2, computed as W4t @ h^T (A @ B^T form) so the output block is a
    # lane-dense (2, tb) slab -> unmasked vector stores.
    o_ref[...] = lax.dot_general(
        w4t_ref[...], h,
        dimension_numbers=(((1,), (1,)), ((), ())),
        preferred_element_type=jnp.float32,
    ) + b4_ref[...]                                                      # (2, tb)


def prepare_weights(w1, w2, w3, w4, b4):
    """Fold the PyTorch forward's slicing / concat / 1/500000 scale into
    zero-padded weights.  Call once, reuse for every forward call.
    Weights are stored (in, out)."""
    # Fused first-layer weight: columns [0,50) = champ_fc1 on x[:,1:305];
    # columns [50,82) = fc1 rows for x[:,0:1] and x[:,305:329].
    wf = jnp.zeros((IN_FEATURES, FUSED_WIDTH), jnp.float32)
    wf = wf.at[1:305, 0:CHAMP1].set(w1)
    wf = wf.at[0:1, FC1_LO:FC1_HI].set(w3[0:1, :])
    wf = wf.at[305:329, FC1_LO:FC1_HI].set(w3[21:45, :])

    # champ_fc2, rows padded from 50 -> 128 (zeros kill non-champ lanes).
    w2p = jnp.zeros((FUSED_WIDTH, CHAMP2), jnp.float32).at[0:CHAMP1, :].set(w2)

    # fc1 rows for the champ features, 1/500000 folded in (scale commutes with
    # the bias-free linear layer), output columns placed at lanes [50,82).
    w3b = jnp.zeros((CHAMP2, FUSED_WIDTH), jnp.float32)
    w3b = w3b.at[:, FC1_LO:FC1_HI].set(w3[1:21, :] * (1.0 / 500000.0))

    # fc2 weight stored transposed (out, 128) with its rows at lanes [50,82).
    w4t = jnp.zeros((2, FUSED_WIDTH), jnp.float32).at[:, FC1_LO:FC1_HI].set(w4.T)
    b4c = b4.reshape(2, 1).astype(jnp.float32)
    return wf, w2p, w3b, w4t, b4c


def net_forward(x, prepared, *, tile_b=2048):
    """x: (B, 329) f32.  `prepared` from prepare_weights().  Returns (B, 2) f32."""
    wf, w2p, w3b, w4t, b4c = prepared
    B = x.shape[0]

    def rup(v, m):
        return ((v + m - 1) // m) * m

    # Batch tile: multiple of 128 (lane-dense transposed output block), capped
    # so the grid has >= 2 steps when possible (keeps both v7x TensorCores
    # busy) and so double-buffered x (~2*tb*329*4 B) fits every generation's
    # default scoped VMEM at the tb=2048 default.
    tb = min(rup(tile_b, 128), max(128, rup(pl.cdiv(B, 2), 128)))
    grid = (pl.cdiv(B, tb),)   # unpadded x: Pallas masks the partial last block

    def resident(a):
        # full-array block + constant index map -> stays resident in VMEM
        return pl.BlockSpec(a.shape, lambda i: (0, 0))

    out_t = pl.pallas_call(
        net_kernel,
        out_shape=jax.ShapeDtypeStruct((2, B), jnp.float32),
        grid=grid,
        in_specs=[
            pl.BlockSpec((tb, IN_FEATURES), lambda i: (i, 0)),   # streamed x tile
            resident(wf), resident(w2p), resident(w3b),
            resident(w4t), resident(b4c),
        ],
        out_specs=pl.BlockSpec((2, tb), lambda i: (0, i)),       # lane-dense output
        compiler_params=pltpu.CompilerParams(dimension_semantics=("parallel",)),
    )(x, wf, w2p, w3b, w4t, b4c)
    return out_t.T                                               # (B, 2)


def net_reference(x, w1, w2, w3, w4, b4):
    c = _leaky_relu(x[:, 1:305] @ w1)
    c = _leaky_relu(c @ w2)
    c = c * (1.0 / 500000.0)
    n = jnp.concatenate([x[:, 0:1], c, x[:, 305:]], axis=1)
    h = _leaky_relu(n @ w3)
    return h @ w4 + b4[None, :]


def _init_linear(key, fan_in, fan_out):
    # Deterministic, torch-like uniform(-1/sqrt(fan_in), 1/sqrt(fan_in)) init.
    bound = 1.0 / jnp.sqrt(jnp.float32(fan_in))
    return jax.random.uniform(key, (fan_in, fan_out), jnp.float32, -bound, bound)


if __name__ == "__main__":
    root = jax.random.PRNGKey(0)
    kx, k1, k2, k3, k4, kb = jax.random.split(root, 6)

    B = 300                               # not a tile multiple -> exercises the masked tail block
    x = jax.random.normal(kx, (B, IN_FEATURES), jnp.float32)

    w1 = _init_linear(k1, 304, 50)        # champ_fc1 (no bias)
    w2 = _init_linear(k2, 50, 20)         # champ_fc2 (no bias)
    w3 = _init_linear(k3, 45, 32)         # fc1 (no bias)
    w4 = _init_linear(k4, 32, 2)          # fc2 weight
    b4 = jax.random.uniform(kb, (2,), jnp.float32,
                            -1.0 / jnp.sqrt(32.0), 1.0 / jnp.sqrt(32.0))  # fc2 bias

    prepared = prepare_weights(w1, w2, w3, w4, b4)   # hoisted: build once, reuse

    # tile_b=2048 resolves to tb=256 here -> grid=(2,), so the multi-step grid,
    # resident weights, and the masked partial tail block all get exercised.
    out = net_forward(x, prepared, tile_b=2048)
    out = jax.block_until_ready(out)

    ref = net_reference(x, w1, w2, w3, w4, b4)
    assert out.shape == (B, 2) and out.dtype == jnp.float32
    # Both paths push f32 through the MXU at default matmul precision (bf16
    # multiply passes), and the kernel fuses/pads the matmuls differently, so
    # allow for reduced-precision rounding differences.
    assert jnp.allclose(out, ref, atol=5e-3, rtol=5e-3), "mismatch vs JAX reference"
    print("KERNEL_OK")
</pallas_src>

<mosaic_0001>
module attributes {stable_mosaic.version = 11 : i64} {
  func.func @net_kernel(%arg0: i32, %arg1: memref<256x329xf32, #tpu.memory_space<vmem>>, %arg2: memref<329x128xf32, #tpu.memory_space<vmem>>, %arg3: memref<128x20xf32, #tpu.memory_space<vmem>>, %arg4: memref<20x128xf32, #tpu.memory_space<vmem>>, %arg5: memref<2x128xf32, #tpu.memory_space<vmem>>, %arg6: memref<2x1xf32, #tpu.memory_space<vmem>>, %arg7: memref<2x256xf32, #tpu.memory_space<vmem>>) attributes {dimension_semantics = [#tpu.dimension_semantics<parallel>], iteration_bounds = array<i64: 2>, scalar_prefetch = 0 : i64, scratch_operands = 0 : i64, tpu.core_type = #tpu.core_type<tc>, window_params = [{transform_indices = @transform_0, window_bounds = array<i64: 256, 329>}, {pipeline_mode = #tpu.pipeline_mode<synchronous>, transform_indices = @transform_1, window_bounds = array<i64: 329, 128>}, {pipeline_mode = #tpu.pipeline_mode<synchronous>, transform_indices = @transform_2, window_bounds = array<i64: 128, 20>}, {pipeline_mode = #tpu.pipeline_mode<synchronous>, transform_indices = @transform_3, window_bounds = array<i64: 20, 128>}, {pipeline_mode = #tpu.pipeline_mode<synchronous>, transform_indices = @transform_4, window_bounds = array<i64: 2, 128>}, {pipeline_mode = #tpu.pipeline_mode<synchronous>, transform_indices = @transform_5, window_bounds = array<i64: 2, 1>}, {transform_indices = @transform_6, window_bounds = array<i64: 2, 256>}]} {
    %c0 = arith.constant 0 : index
    %c0_0 = arith.constant 0 : index
    %0 = vector.load %arg1[%c0, %c0_0] : memref<256x329xf32, #tpu.memory_space<vmem>>, vector<256x329xf32>
    %c0_1 = arith.constant 0 : index
    %c0_2 = arith.constant 0 : index
    %1 = vector.load %arg2[%c0_1, %c0_2] : memref<329x128xf32, #tpu.memory_space<vmem>>, vector<329x128xf32>
    %cst = arith.constant dense<0.000000e+00> : vector<256x128xf32>
    %2 = tpu.matmul %0, %1, %cst {dimension_numbers = #tpu.dot_dimension_numbers<[1], [0], [0], [1], [0, 0, 1, 1], [], []>} : vector<256x329xf32>, vector<329x128xf32>, vector<256x128xf32> -> vector<256x128xf32>
    %cst_3 = arith.constant 0.000000e+00 : f32
    %3 = vector.broadcast %cst_3 : f32 to vector<256x128xf32>
    %4 = arith.cmpf ogt, %2, %3 : vector<256x128xf32>
    %cst_4 = arith.constant 0.00999999977 : f32
    %5 = vector.broadcast %cst_4 : f32 to vector<256x128xf32>
    %6 = arith.mulf %5, %2 : vector<256x128xf32>
    %7 = arith.select %4, %2, %6 : vector<256x128xi1>, vector<256x128xf32>
    %c0_5 = arith.constant 0 : index
    %c0_6 = arith.constant 0 : index
    %8 = vector.load %arg3[%c0_5, %c0_6] : memref<128x20xf32, #tpu.memory_space<vmem>>, vector<128x20xf32>
    %cst_7 = arith.constant dense<0.000000e+00> : vector<256x20xf32>
    %9 = tpu.matmul %7, %8, %cst_7 {dimension_numbers = #tpu.dot_dimension_numbers<[1], [0], [0], [1], [0, 0, 1, 1], [], []>} : vector<256x128xf32>, vector<128x20xf32>, vector<256x20xf32> -> vector<256x20xf32>
    %cst_8 = arith.constant 0.000000e+00 : f32
    %10 = vector.broadcast %cst_8 : f32 to vector<256x20xf32>
    %11 = arith.cmpf ogt, %9, %10 : vector<256x20xf32>
    %cst_9 = arith.constant 0.00999999977 : f32
    %12 = vector.broadcast %cst_9 : f32 to vector<256x20xf32>
    %13 = arith.mulf %12, %9 : vector<256x20xf32>
    %14 = arith.select %11, %9, %13 : vector<256x20xi1>, vector<256x20xf32>
    %c0_10 = arith.constant 0 : index
    %c0_11 = arith.constant 0 : index
    %15 = vector.load %arg4[%c0_10, %c0_11] : memref<20x128xf32, #tpu.memory_space<vmem>>, vector<20x128xf32>
    %cst_12 = arith.constant dense<0.000000e+00> : vector<256x128xf32>
    %16 = tpu.matmul %14, %15, %cst_12 {dimension_numbers = #tpu.dot_dimension_numbers<[1], [0], [0], [1], [0, 0, 1, 1], [], []>} : vector<256x20xf32>, vector<20x128xf32>, vector<256x128xf32> -> vector<256x128xf32>
    %17 = arith.addf %2, %16 : vector<256x128xf32>
    %cst_13 = arith.constant 0.000000e+00 : f32
    %18 = vector.broadcast %cst_13 : f32 to vector<256x128xf32>
    %19 = arith.cmpf ogt, %17, %18 : vector<256x128xf32>
    %cst_14 = arith.constant 0.00999999977 : f32
    %20 = vector.broadcast %cst_14 : f32 to vector<256x128xf32>
    %21 = arith.mulf %20, %17 : vector<256x128xf32>
    %22 = arith.select %19, %17, %21 : vector<256x128xi1>, vector<256x128xf32>
    %c0_15 = arith.constant 0 : index
    %c0_16 = arith.constant 0 : index
    %23 = vector.load %arg5[%c0_15, %c0_16] : memref<2x128xf32, #tpu.memory_space<vmem>>, vector<2x128xf32>
    %cst_17 = arith.constant dense<0.000000e+00> : vector<2x256xf32>
    %24 = tpu.matmul %23, %22, %cst_17 {dimension_numbers = #tpu.dot_dimension_numbers<[1], [1], [0], [0], [0, 0, 1, 0], [], []>} : vector<2x128xf32>, vector<256x128xf32>, vector<2x256xf32> -> vector<2x256xf32>
    %c0_18 = arith.constant 0 : index
    %c0_19 = arith.constant 0 : index
    %25 = vector.load %arg6[%c0_18, %c0_19] : memref<2x1xf32, #tpu.memory_space<vmem>>, vector<2x1xf32>
    %26 = vector.broadcast %25 : vector<2x1xf32> to vector<2x256xf32>
    %27 = arith.addf %24, %26 : vector<2x256xf32>
    %c0_20 = arith.constant 0 : index
    %c0_21 = arith.constant 0 : index
    %28 = vector.load %arg7[%c0_20, %c0_21] : memref<2x256xf32, #tpu.memory_space<vmem>>, vector<2x256xf32>
    tpu.vector_store %arg7[%c0_20, %c0_21], %27 {strides = array<i32>} : memref<2x256xf32, #tpu.memory_space<vmem>>, vector<2x256xf32>,
    return
  }
  func.func @transform_0(%arg0: i32) -> (i32, i32) {
    %c0_i32 = arith.constant 0 : i32
    %c0_i32_0 = arith.constant 0 : i32
    return %arg0, %c0_i32 : i32, i32
  }
  func.func @transform_1(%arg0: i32) -> (i32, i32) {
    %c0_i32 = arith.constant 0 : i32
    %c0_i32_0 = arith.constant 0 : i32
    %c0_i32_1 = arith.constant 0 : i32
    return %c0_i32, %c0_i32_0 : i32, i32
  }
  func.func @transform_2(%arg0: i32) -> (i32, i32) {
    %c0_i32 = arith.constant 0 : i32
    %c0_i32_0 = arith.constant 0 : i32
    %c0_i32_1 = arith.constant 0 : i32
    return %c0_i32, %c0_i32_0 : i32, i32
  }
  func.func @transform_3(%arg0: i32) -> (i32, i32) {
    %c0_i32 = arith.constant 0 : i32
    %c0_i32_0 = arith.constant 0 : i32
    %c0_i32_1 = arith.constant 0 : i32
    return %c0_i32, %c0_i32_0 : i32, i32
  }
  func.func @transform_4(%arg0: i32) -> (i32, i32) {
    %c0_i32 = arith.constant 0 : i32
    %c0_i32_0 = arith.constant 0 : i32
    %c0_i32_1 = arith.constant 0 : i32
    return %c0_i32, %c0_i32_0 : i32, i32
  }
  func.func @transform_5(%arg0: i32) -> (i32, i32) {
    %c0_i32 = arith.constant 0 : i32
    %c0_i32_0 = arith.constant 0 : i32
    %c0_i32_1 = arith.constant 0 : i32
    return %c0_i32, %c0_i32_0 : i32, i32
  }
  func.func @transform_6(%arg0: i32) -> (i32, i32) {
    %c0_i32 = arith.constant 0 : i32
    %c0_i32_0 = arith.constant 0 : i32
    return %c0_i32, %arg0 : i32, i32
  }
}

</mosaic_0001>

<bundles_post_ra>
// kernel: tpu_custom_call.1
= control target key start
LH: loop header
LB: loop body
LE: loop exit
PB: predicated region body
PF: predicated region fallthrough
CT: control target
= control target key end

     0   :  { %s2894_s0 = inlined_call_operand.hbm [shape: f32[300,329], index: 0, kind: input, shape index: {}]   ;;  %s2895_s1 = inlined_call_operand.hbm [shape: f32[329,128], index: 1, kind: input, shape index: {}]   ;;  %s2896_s2 = inlined_call_operand.vmem [shape: f32[128,20], index: 2, kind: input, shape index: {}]   ;;  %s2897_s3 = inlined_call_operand.vmem [shape: f32[20,128], index: 3, kind: input, shape index: {}]   ;;  %s2898_s4 = inlined_call_operand.vmem [shape: f32[2,128], index: 4, kind: input, shape index: {}]   ;;  %s2899_s5 = inlined_call_operand.vmem [shape: f32[2,1], index: 5, kind: input, shape index: {}]   ;;  %s2900_s6 = inlined_call_operand.hbm [shape: f32[2,300], index: 6, kind: output, shape index: {}]  }
   0x1   :  { %2906 = sst [smem:[#allocation14_spill]] %s2895_s1 }
   0x2   :  { %11 = vsyncpa [#allocation3], 0 }
   0x3   :  { %13 = vsyncpa [#allocation3 + $0x1], 0 }
   0x4   :  { %14 = vsyncpa [#allocation6], 0 }
   0x5   :  { %15 = vsyncpa [#allocation4], 0 }
   0x6   :  { %17 = vsyncpa [#allocation4 + $0x1], 0  ;;  %s2091_s21 = smov 0   ;;  %s2093_s22 = smov 0  }
   0x7   :  { %s2095_s23 = smov 0   ;;  %s2097_s24 = smov 0  }
   0x8 LB: > { %2907 = sst [smem:[#allocation11_spill]] %s2042_s23  ;;  %s2112_s25 = sadd.s32 4294967295, %s2046_s24   ;;  %s2046_s24 = sphi %s2097_s24, %s2928_s24   ;;  %s2042_s23 = sphi %s2095_s23, %s2925_s23   ;;  %s2038_s22 = sphi %s2093_s22, %s2927_s22   ;;  %s2034_s21 = sphi %s2091_s21, %s2926_s21  }
   0x9   : > { %s1711_s26 = sadd.s32 4294967294, %s2046_s24   ;;  %s2116_s27 = sadd.s32 1, %s2046_s24  }
   0xa   : > { %s30_s28 = sadd.s32 1, %s2042_s23  ;;  %s27_s29 = ssub.s32 %s2046_s24, %s2116_s27 }
   0xb   : > { %p37_p0 = scmp.ne.s32.totalorder %s2042_s23, %s2038_s22  ;;  %p28_p1 = scmp.eq.s32.totalorder %s27_s29, 0 }
   0xc   : > { %p38_p2 = scmp.eq.s32.totalorder %s2046_s24, 0  ;;  %p43_p3 = scmp.ne.s32.totalorder %s2038_s22, %s2034_s21 }
   0xd   : > { %p2905_p4 = scmp.eq.s32.totalorder %s2112_s25, 0  ;;  %p172_p7 = scmp.eq.s32.totalorder %s2112_s25, 1 }
   0xe   : > { %s2128_s30 = scalar_select %p28_p1, %s2042_s23, %s30_s28  }
   0xf   : > { %p2130_p5 = por %p38_p2, %p37_p0  ;;  %p2136_p6 = por %p2905_p4, %p43_p3 }
  0x10   : > { %2908 = sst [smem:[#allocation12_spill]] %s2128_s30  ;;  %p178_p8 = scmp.eq.s32.totalorder %s1711_s26, 1 }
  0x11   : > { %p1712_p9 = scmp.ge.s32.totalorder %s2046_s24, 1  ;;  %p185_p10 = scmp.lt.s32.totalorder %s2046_s24, 3 }
  0x12   : > { %p2143_p11 = por %p172_p7, %p37_p0  ;;  %p2147_p12 = por %p178_p8, %p43_p3 }
  0x13   : > { %p2151_p13 = pnand %p1712_p9, %p185_p10  ;;  %s2914_s1 = sld [smem:[#allocation14_spill]] }
  0x14   : > { %s2912_s10 = scalar_select %p2147_p12, 1, 0 }
  0x15   : > { %p1846_p1 = pneg %p2151_p13  ;;  %s2048_s15 = smov [#allocation5]  }
  0x16   : > { %s198_s16 = sshll.u32 %s2048_s15, 4  ;;  %s2049_s17 = smov 128   ;;  %s199_s16 = int_to_ptr.vmem [resolvable:$true] %s198_s16 }
  0x17   : > { %p1847_p0 = pnand %p1846_p1, %p2905_p4  ;;  %s2050_s18 = smov 8  }
  0x18   : > { %p2903_p2 = scmp.ge.s32.totalorder %s2046_s24, 2 }
  0x19   : > { %s196_s14 = sshll.u32 %s2914_s1, 4  ;;  %s197_s14 = int_to_ptr.hbm [resolvable:$true] %s196_s14 }
  0x1a   : > { %1849 = dma.hbm_to_vmem [thread:$0]  (!%p1847_p0), %s197_s14, 5376, %s199_s16, [#allocation6], %s2049_s17, %s2049_s17, %s2050_s18  }
  0x1b   : > { %220 = sbr.rel (%p2903_p2) target bundleno = 84 (0x54), region = 36 }
  0x20   : > { %223 = sbr.rel (!%p2130_p5) target bundleno = 84 (0x54), region = 40 }
  0x25   : > { %s224_s19 = sand.u32 1, %s2042_s23   ;;  %s1715_s20 = sshll.u32 %s2046_s24, 5 }
  0x26   : > { %s1837_s26 = smul.u32 768, %s224_s19  ;;  %s230_s28 = ssub.s32 38, %s1715_s20 }
  0x27   : > { %p231_p3 = scmp.lt.s32.totalorder %s230_s28, 32  ;;  %s2169_s14 = scalar_lea.sflag [#allocation3], %s224_s19 }
  0x28   : > { %s228_s15 = scalar_lea.vmem [#allocation2], %s1837_s26 }
  0x29   : > { %s2930_s28 = smov (!%p231_p3, %s230_s28), 32 }
  0x2a   : > { %s1717_s29 = smul.u32 24, %s2930_s28 }
  0x2c   : > { %s235_s12 = ssub.s32 768, %s1717_s29 }
  0x2d   : > { %s236_s13 = sshll.u32 %s235_s12, 4 }
  0x2e   : > { %237 = vsyncadd %s2169_s14, %s236_s13  ;;  %p2172_p7 = scmp.ne.s32.totalorder %s1717_s29, 0  ;;  %s1838_s16 = smul.u32 768, %s2046_s24 }
  0x2f   : > { %s2177_s17 = sshll.u32 %s228_s15, 4  ;;  %s2179_s18 = smul.u32 384, %s2930_s28 }
  0x30   : > { %2916 = sst [smem:[#allocation13_spill]] %s2177_s17  ;;  %s241_s19 = scalar_lea.hbm %s2894_s0, %s1838_s16 }
  0x31   : > { %s243_s26 = sshll.u32 %s241_s19, 4  ;;  %s1928_s12 = sshrl.u32 %s2179_s18, 4  ;;  %s2185_s26 = int_to_ptr.hbm [resolvable:$true] %s243_s26 }
  0x32   : > { %s1926_s29 = sshra.s32 %s2185_s26, 4  ;;  %s1964_s13 = sshll.u32 %s1928_s12, 4  ;;  %s1927_s29 = int_to_ptr.hbm [resolvable:$true] %s1926_s29 }
  0x33   : > { %p1930_p5 = scmp.ne.s32.totalorder %s1964_s13, %s2179_s18  ;;  %s1931_s15 = sadd.s32 1, %s1928_s12 }
  0x34   : > { %s1937_s16 = scalar_lea.hbm %s2894_s0, 912  ;;  %p1938_p1 = scmp.lt.s32.totalorder %s1927_s29, %s2894_s0 }
  0x35   : > { %s2932_s15 = smov (!%p1930_p5, %s1931_s15), %s1928_s12 }
  0x36   : > { %s1933_s28 = scalar_lea.hbm %s1927_s29, %s2932_s15 }
  0x37   : > { %p1934_p8 = scmp.ne.s32.totalorder %s1927_s29, %s1933_s28  ;;  %p1939_p0 = scmp.lt.s32.totalorder %s1937_s16, %s1933_s28 }
  0x39   : > { %p1935_p9 = pnand %p1934_p8, %p2172_p7  ;;  %p1940_p3 = por %p1939_p0, %p1938_p1 }
  0x3b   : > { %p1936_p10 = pneg %p1935_p9 }
  0x3d   : > { %p1941_p2 = pnand %p1940_p3, %p1936_p10 }
  0x3f   : > { %1944 = shalt.err (!%p1941_p2)
}
  0x40   : > { %s2917_s13 = sld [smem:[#allocation13_spill]]  ;;  %s2051_s1 = smov [#allocation2]  }
  0x41   : > { %s1956_s20 = scalar_lea.vmem %s2051_s1, 1536 }
  0x46   : > { %s2918_s30 = int_to_ptr.vmem [resolvable:$true] %s2917_s13 }
  0x47   : > { %s1945_s12 = sshra.s32 %s2918_s30, 4  ;;  %s1946_s12 = int_to_ptr.vmem [resolvable:$true] %s1945_s12 }
  0x48   : > { %s1952_s23 = scalar_lea.vmem %s1946_s12, %s2932_s15 }
  0x49   : > { %p1953_p5 = scmp.ne.s32.totalorder %s1946_s12, %s1952_s23  ;;  %p1958_p4 = scmp.lt.s32.totalorder %s1956_s20, %s1952_s23 }
  0x4b   : > { %p1954_p8 = pnand %p1953_p5, %p2172_p7 }
  0x4d   : > { %p1955_p9 = pneg %p1954_p8 }
  0x4f   : > { %p1960_p12 = pnand %p1958_p4, %p1955_p9 }
  0x51   : > { %1963 = shalt.err (!%p1960_p12)
}
  0x52   : > { %s2052_s17 = smov 384   ;;  %s2053_s29 = smov 24  }
  0x53   : > { %251 = dma.hbm_to_vmem [thread:$0]  (%p2172_p7), %s2185_s26, %s2179_s18, %s2918_s30, %s2169_s14, %s2052_s17, %s2052_s17, %s2053_s29  }
  0x54 PF: > { %257 = sbr.rel (%p2151_p13) target bundleno = 1217 (0x4c1), region = 44  ;;  %s2212_s23 = sand.u32 (!%p2151_p13), 1, %s2038_s22  }
  0x55   : > { %s1839_s15 = smul.u32 (!%p2151_p13), 768, %s2212_s23  ;;  %s260_s28 = scalar_lea.sflag (!%p2151_p13), [#allocation3], %s2212_s23 }
  0x57   : > { %s2216_s16 = scalar_lea.vmem (!%p2151_p13), [#allocation2], %s1839_s15 }
  0x59   : > { %2021 = dma.done.wait (%p2136_p6), %s260_s28, 12288  }
  0x5a   : > { %2023 = vsyncadd (%p2136_p6), %s260_s28, 4294955008  ;;  %p2919_p4 = scmp.eq.s32.totalorder %s2112_s25, 0 }
  0x5c   : > { %2025 = dma.done.wait (%p2919_p4), [#allocation6], 5376   ;;  %p2920_p12 = pmov %p2919_p4 }
  0x5d   : > { %v420_v0 = vld [vmem:[#allocation5 + $0x78] sm:$0xff]  ;;  %v419_v1 = vld [vmem:[#allocation5 + $0x70] sm:$0xff]  ;;  %v418_v2 = vld [vmem:[#allocation5 + $0x68] sm:$0xff]  ;;  %vm544_vm0 = vcmask 1040384   ;;  %vm447_vm1 = vcmask 596992   ;;  %vm1308_vm15 = vcmask 1043456  }
  0x5e   : > { %2027 = vsyncadd (%p2920_p12), [#allocation6], 4294961920  ;;  %548 = vmatpush.msra.mxu0 %v420_v0  ;;  %1801 = vmatpush.msra.mxu1 %v420_v0  ;;  %v417_v3 = vld [vmem:[#allocation5 + $0x60] sm:$0xff]  ;;  %v416_v4 = vld [vmem:[#allocation5 + $0x58] sm:$0xff]  ;;  %s1724_s1 = sshll.u32 %s2212_s23, 2  ;;  %s1608_s20 = scalar_lea.sflag [#allocation4], %s2212_s23 }
  0x5f   : > { %v415_v5 = vld [vmem:[#allocation5 + $0x50] sm:$0xff]  ;;  %v414_v6 = vld [vmem:[#allocation5 + $0x48] sm:$0xff]  ;;  %v413_v7 = vld [vmem:[#allocation5 + $0x40] sm:$0xff]  ;;  %s1792_s17 = sshll.u32 (%p2143_p11), %s2112_s25, 1 }
  0x60   : > { %549 = vmatpush.msra.mxu0 %v419_v1  ;;  %1802 = vmatpush.msra.mxu1 %v419_v1  ;;  %v412_v8 = vld [vmem:[#allocation5 + $0x38] sm:$0xff]  ;;  %v411_v9 = vld [vmem:[#allocation5 + $0x30] sm:$0xff]  ;;  %v410_v10 = vld [vmem:[#allocation5 + $0x28] sm:$0xff]  ;;  %s1616_s29 = ssub.s32 (%p2143_p11), 3, %s1792_s17 }
  0x61   : > { %v409_v11 = vld [vmem:[#allocation5 + $0x20] sm:$0xff]  ;;  %v408_v12 = vld [vmem:[#allocation5 + $0x18] sm:$0xff]  ;;  %v407_v13 = vld [vmem:[#allocation5 + $0x10] sm:$0xff]  ;;  %p1617_p6 = scmp.lt.s32.totalorder (%p2143_p11), %s1616_s29, 2 }
  0x62   : > { %550 = vmatpush.msra.mxu0 %v418_v2  ;;  %1803 = vmatpush.msra.mxu1 %v418_v2  ;;  %v406_v14 = vld [vmem:[#allocation5 + $0x8] sm:$0xff]  ;;  %v405_v15 = vld [vmem:[#allocation5] sm:$0xff]  ;;  %v436_v18 = vld [vmem:[#allocation5 + $0xf8] sm:$0xff] }
  0x63   : > { %v309_v16 = vld [vmem:[%s2216_s16] sm:$0xff]  ;;  %v390_v17 = vld [vmem:[%s2216_s16 + $0x288] sm:$0xff]  ;;  %v435_v19 = vld [vmem:[#allocation5 + $0xf0] sm:$0xff] }
  0x64   : > { %551 = vmatpush.msra.mxu0 %v417_v3  ;;  %1804 = vmatpush.msra.mxu1 %v417_v3  ;;  %v434_v20 = vld [vmem:[#allocation5 + $0xe8] sm:$0xff]  ;;  %v433_v21 = vld [vmem:[#allocation5 + $0xe0] sm:$0xff]  ;;  %v312_v22 = vld [vmem:[%s2216_s16 + $0x18] sm:$0xff] }
  0x65   : > { %v393_v23 = vld [vmem:[%s2216_s16 + $0x2a0] sm:$0xff]  ;;  %v432_v24 = vld [vmem:[#allocation5 + $0xd8] sm:$0xff]  ;;  %v431_v25 = vld [vmem:[#allocation5 + $0xd0] sm:$0xff] }
  0x66   : > { %552 = vmatpush.msra.mxu0 %v416_v4  ;;  %1805 = vmatpush.msra.mxu1 %v416_v4  ;;  %v430_v26 = vld [vmem:[#allocation5 + $0xc8] sm:$0xff]  ;;  %v429_v27 = vld [vmem:[#allocation5 + $0xc0] sm:$0xff]  ;;  %v315_v28 = vld [vmem:[%s2216_s16 + $0x30] sm:$0xff] }
  0x67   : > { %v396_v29 = vld [vmem:[%s2216_s16 + $0x2b8] sm:$0xff]  ;;  %v427_v31 = vld [vmem:[#allocation5 + $0xb0] sm:$0xff]  ;;  %v426_v32 = vld [vmem:[#allocation5 + $0xa8] sm:$0xff] }
  0x68   : > { %553 = vmatpush.msra.mxu0 %v415_v5  ;;  %1806 = vmatpush.msra.mxu1 %v415_v5  ;;  %v428_v30 = vld [vmem:[#allocation5 + $0xb8] sm:$0xff]  ;;  %v425_v33 = vld [vmem:[#allocation5 + $0xa0] sm:$0xff]  ;;  %v318_v34 = vld [vmem:[%s2216_s16 + $0x48] sm:$0xff] }
  0x69   : > { %v399_v35 = vld [vmem:[%s2216_s16 + $0x2d0] sm:$0xff]  ;;  %v424_v36 = vld [vmem:[#allocation5 + $0x98] sm:$0xff]  ;;  %v422_v38 = vld [vmem:[#allocation5 + $0x88] sm:$0xff] }
  0x6a   : > { %554 = vmatpush.msra.mxu0 %v414_v6  ;;  %1807 = vmatpush.msra.mxu1 %v414_v6  ;;  %v423_v37 = vld [vmem:[#allocation5 + $0x90] sm:$0xff]  ;;  %v421_v39 = vld [vmem:[#allocation5 + $0x80] sm:$0xff]  ;;  %v402_v41 = vld [vmem:[%s2216_s16 + $0x2e8] sm:$0xff] }
  0x6b   : > { %v321_v40 = vld [vmem:[%s2216_s16 + $0x60] sm:$0xff]  ;;  %v324_v42 = vld [vmem:[%s2216_s16 + $0x78] sm:$0xff]  ;;  %v310_v43 = vld [vmem:[%s2216_s16 + $0x8] sm:$0xff] }
  0x6c   : > { %555 = vmatpush.msra.mxu0 %v413_v7  ;;  %1808 = vmatpush.msra.mxu1 %v413_v7  ;;  %v327_v44 = vld [vmem:[%s2216_s16 + $0x90] sm:$0xff]  ;;  %v313_v45 = vld [vmem:[%s2216_s16 + $0x20] sm:$0xff]  ;;  %v330_v46 = vld [vmem:[%s2216_s16 + $0xa8] sm:$0xff] }
  0x6d   : > { %v316_v47 = vld [vmem:[%s2216_s16 + $0x38] sm:$0xff]  ;;  %v333_v48 = vld [vmem:[%s2216_s16 + $0xc0] sm:$0xff]  ;;  %v319_v49 = vld [vmem:[%s2216_s16 + $0x50] sm:$0xff] }
  0x6e   : > { %556 = vmatpush.msra.mxu0 %v412_v8  ;;  %1809 = vmatpush.msra.mxu1 %v412_v8  ;;  %v336_v50 = vld [vmem:[%s2216_s16 + $0xd8] sm:$0xff]  ;;  %v322_v51 = vld [vmem:[%s2216_s16 + $0x68] sm:$0xff]  ;;  %v339_v52 = vld [vmem:[%s2216_s16 + $0xf0] sm:$0xff] }
  0x6f   : > { %v325_v53 = vld [vmem:[%s2216_s16 + $0x80] sm:$0xff]  ;;  %v446_v54 = vld [vmem:[#allocation5 + $0x148] sm:$0x1]  ;;  %v444_v56 = vld [vmem:[#allocation5 + $0x138] sm:$0xff] }
  0x70   : > { %557 = vmatpush.msra.mxu0 %v411_v9  ;;  %1810 = vmatpush.msra.mxu1 %v411_v9  ;;  %v445_v55 = vld [vmem:[#allocation5 + $0x140] sm:$0xff]  ;;  %v443_v57 = vld [vmem:[#allocation5 + $0x130] sm:$0xff]  ;;  %v342_v58 = vld [vmem:[%s2216_s16 + $0x108] sm:$0xff] }
  0x71   : > { %1817 = vmatpush.msk.msra.mxu2 %vm544_vm0, %v446_v54  ;;  %1818 = vmatpush.msk.msra.mxu3 %vm544_vm0, %v446_v54  ;;  %v328_v59 = vld [vmem:[%s2216_s16 + $0x98] sm:$0xff]  ;;  %v442_v60 = vld [vmem:[#allocation5 + $0x128] sm:$0xff]  ;;  %v441_v61 = vld [vmem:[#allocation5 + $0x120] sm:$0xff] }
  0x72   : > { %558 = vmatpush.msra.mxu0 %v410_v10  ;;  %1811 = vmatpush.msra.mxu1 %v410_v10  ;;  %v440_v62 = vld [vmem:[#allocation5 + $0x118] sm:$0xff]  ;;  %v345_v63 = vld [vmem:[%s2216_s16 + $0x120] sm:$0xff]  ;;  %v331_v0 = vld [vmem:[%s2216_s16 + $0xb0] sm:$0xff] }
  0x73   : > { %1819 = vmatpush.msra.mxu2 %v445_v55  ;;  %1820 = vmatpush.msra.mxu3 %v445_v55  ;;  %v439_v1 = vld [vmem:[#allocation5 + $0x110] sm:$0xff]  ;;  %v438_v2 = vld [vmem:[#allocation5 + $0x108] sm:$0xff]  ;;  %v437_v3 = vld [vmem:[#allocation5 + $0x100] sm:$0xff] }
  0x74   : > { %559 = vmatpush.msra.mxu0 %v409_v11  ;;  %1812 = vmatpush.msra.mxu1 %v409_v11  ;;  %v347_v4 = vld [vmem:[%s2216_s16 + $0x130] sm:$0xff]  ;;  %v348_v5 = vld [vmem:[%s2216_s16 + $0x138] sm:$0xff]  ;;  %v334_v6 = vld [vmem:[%s2216_s16 + $0xc8] sm:$0xff] }
  0x75   : > { %1821 = vmatpush.msra.mxu2 %v444_v56  ;;  %1822 = vmatpush.msra.mxu3 %v444_v56  ;;  %v350_v7 = vld [vmem:[%s2216_s16 + $0x148] sm:$0xff]  ;;  %v351_v8 = vld [vmem:[%s2216_s16 + $0x150] sm:$0xff]  ;;  %v337_v9 = vld [vmem:[%s2216_s16 + $0xe0] sm:$0xff] }
  0x76   : > { %560 = vmatpush.msra.mxu0 %v408_v12  ;;  %1813 = vmatpush.msra.mxu1 %v408_v12  ;;  %v353_v10 = vld [vmem:[%s2216_s16 + $0x160] sm:$0xff]  ;;  %v354_v11 = vld [vmem:[%s2216_s16 + $0x168] sm:$0xff]  ;;  %v340_v12 = vld [vmem:[%s2216_s16 + $0xf8] sm:$0xff] }
  0x77   : > { %1823 = vmatpush.msra.mxu2 %v443_v57  ;;  %1824 = vmatpush.msra.mxu3 %v443_v57 }
  0x78   : > { %561 = vmatpush.msra.mxu0 %v407_v13  ;;  %1814 = vmatpush.msra.mxu1 %v407_v13  ;;  %v356_v13 = vld [vmem:[%s2216_s16 + $0x178] sm:$0xff] }
  0x79   : > { %1825 = vmatpush.msra.mxu2 %v442_v60  ;;  %1826 = vmatpush.msra.mxu3 %v442_v60 }
  0x7a   : > { %562 = vmatpush.msra.mxu0 %v406_v14  ;;  %1815 = vmatpush.msra.mxu1 %v406_v14 }
  0x7b   : > { %1827 = vmatpush.msra.mxu2 %v441_v61  ;;  %1828 = vmatpush.msra.mxu3 %v441_v61 }
  0x7c   : > { %563 = vmatpush.msra.mxu0 %v405_v15  ;;  %1816 = vmatpush.msra.mxu1 %v405_v15  ;;  %v357_v15 = vld [vmem:[%s2216_s16 + $0x180] sm:$0xff] }
  0x7d   : > { %564 = vmatmul.f32.vlgmr.msra.gmra.mxu0 %v309_v16  ;;  %645 = vmatmul.f32.vlgmr.msra.gmra.mxu1 %v390_v17  ;;  %v343_v16 = vld [vmem:[%s2216_s16 + $0x110] sm:$0xff] }
  0x7e   : > { %661 = vmatpush.msrb.mxu1 %v436_v18  ;;  %1725 = vmatpush.msk.msrb.mxu0 %vm544_vm0, %v446_v54  ;;  %v359_v17 = vld [vmem:[%s2216_s16 + $0x190] sm:$0xff]  ;;  %v384_v54 = vld [vmem:[%s2216_s16 + $0x258] sm:$0xff] }
  0x7f   : > { %1829 = vmatpush.msra.mxu2 %v440_v62  ;;  %1830 = vmatpush.msra.mxu3 %v440_v62 }
  0x80   : > { %662 = vmatpush.msrb.mxu1 %v435_v19  ;;  %781 = vmatpush.msrb.mxu0 %v445_v55  ;;  %v360_v19 = vld [vmem:[%s2216_s16 + $0x198] sm:$0xff]  ;;  %v370_v55 = vld [vmem:[%s2216_s16 + $0x1e8] sm:$0xff] }
  0x81   : > { %1831 = vmatpush.msra.mxu2 %v439_v1  ;;  %1832 = vmatpush.msra.mxu3 %v439_v1 }
  0x82   : > { %663 = vmatpush.msrb.mxu1 %v434_v20  ;;  %782 = vmatpush.msrb.mxu0 %v444_v56  ;;  %v346_v20 = vld [vmem:[%s2216_s16 + $0x128] sm:$0xff] }
  0x83   : > { %1833 = vmatpush.msra.mxu2 %v438_v2  ;;  %1834 = vmatpush.msra.mxu3 %v438_v2 }
  0x84   : > { %664 = vmatpush.msrb.mxu1 %v433_v21  ;;  %783 = vmatpush.msrb.mxu0 %v443_v57  ;;  %v362_v21 = vld [vmem:[%s2216_s16 + $0x1a8] sm:$0xff] }
  0x85   : > { %567 = vmatmul.f32.gmra.mxu0 %v312_v22  ;;  %648 = vmatmul.f32.gmra.mxu1 %v393_v23  ;;  %v363_v23 = vld [vmem:[%s2216_s16 + $0x1b0] sm:$0xff]  ;;  %v386_v57 = vld [vmem:[%s2216_s16 + $0x268] sm:$0xff] }
  0x86   : > { %665 = vmatpush.msrb.mxu1 %v432_v24  ;;  %784 = vmatpush.msrb.mxu0 %v442_v60  ;;  %v349_v24 = vld [vmem:[%s2216_s16 + $0x140] sm:$0xff] }
  0x87   : > { %1835 = vmatpush.msra.mxu2 %v437_v3  ;;  %1836 = vmatpush.msra.mxu3 %v437_v3  ;;  %v373_v60 = vld [vmem:[%s2216_s16 + $0x200] sm:$0xff] }
  0x88   : > { %666 = vmatpush.msrb.mxu1 %v431_v25  ;;  %785 = vmatpush.msrb.mxu0 %v441_v61  ;;  %v365_v25 = vld [vmem:[%s2216_s16 + $0x1c0] sm:$0xff] }
  0x89   : > { %1738 = vmatmul.msk.f32.vlgmr.msra.gmra.mxu2 %vm447_vm1, %v347_v4 }
  0x8a   : > { %667 = vmatpush.msrb.mxu1 %v430_v26  ;;  %786 = vmatpush.msrb.mxu0 %v440_v62  ;;  %v389_v62 = vld [vmem:[%s2216_s16 + $0x280] sm:$0xff] }
  0x8c   : > { %668 = vmatpush.msrb.mxu1 %v429_v27  ;;  %787 = vmatpush.msrb.mxu0 %v439_v1  ;;  %v366_v27 = vld [vmem:[%s2216_s16 + $0x1c8] sm:$0xff]  ;;  %v311_v1 = vld [vmem:[%s2216_s16 + $0x10] sm:$0xff] }
  0x8d   : > { %570 = vmatmul.f32.gmra.mxu0 %v315_v28  ;;  %651 = vmatmul.f32.gmra.mxu1 %v396_v29  ;;  %v352_v28 = vld [vmem:[%s2216_s16 + $0x158] sm:$0xff] }
  0x8e   : > { %669 = vmatpush.msrb.mxu1 %v428_v30  ;;  %788 = vmatpush.msrb.mxu0 %v438_v2  ;;  %v368_v29 = vld [vmem:[%s2216_s16 + $0x1d8] sm:$0xff] }
  0x8f   : > { %v392_v2 = vld [vmem:[%s2216_s16 + $0x298] sm:$0xff] }
  0x90   : > { %670 = vmatpush.msrb.mxu1 %v427_v31  ;;  %789 = vmatpush.msrb.mxu0 %v437_v3  ;;  %v369_v31 = vld [vmem:[%s2216_s16 + $0x1e0] sm:$0xff] }
  0x91   : > { %1739 = vmatmul.msk.f32.gmra.mxu2 %vm447_vm1, %v350_v7  ;;  %v395_v7 = vld [vmem:[%s2216_s16 + $0x2b0] sm:$0xff] }
  0x92   : > { %671 = vmatpush.msrb.mxu1 %v426_v32  ;;  %v355_v32 = vld [vmem:[%s2216_s16 + $0x170] sm:$0xff] }
  0x94   : > { %672 = vmatpush.msrb.mxu1 %v425_v33  ;;  %v371_v33 = vld [vmem:[%s2216_s16 + $0x1f0] sm:$0xff] }
  0x95   : > { %573 = vmatmul.f32.gmra.mxu0 %v318_v34  ;;  %654 = vmatmul.f32.gmra.mxu1 %v399_v35  ;;  %v372_v35 = vld [vmem:[%s2216_s16 + $0x1f8] sm:$0xff] }
  0x96   : > { %673 = vmatpush.msrb.mxu1 %v424_v36  ;;  %v358_v36 = vld [vmem:[%s2216_s16 + $0x188] sm:$0xff] }
  0x98   : > { %674 = vmatpush.msrb.mxu1 %v423_v37 }
  0x99   : > { %1740 = vmatmul.msk.f32.gmra.mxu2 %vm447_vm1, %v353_v10  ;;  %v382_v10 = vld [vmem:[%s2216_s16 + $0x248] sm:$0xff] }
  0x9a   : > { %675 = vmatpush.msrb.mxu1 %v422_v38  ;;  %v374_v38 = vld [vmem:[%s2216_s16 + $0x208] sm:$0xff] }
  0x9c   : > { %676 = vmatpush.msrb.mxu1 %v421_v39 }
  0x9d   : > { %576 = vmatmul.f32.gmra.mxu0 %v321_v40  ;;  %657 = vmatmul.f32.gmra.mxu1 %v402_v41  ;;  %v375_v40 = vld [vmem:[%s2216_s16 + $0x210] sm:$0xff]  ;;  %v361_v41 = vld [vmem:[%s2216_s16 + $0x1a0] sm:$0xff] }
  0xa1   : > { %1741 = vmatmul.msk.f32.gmra.mxu2 %vm447_vm1, %v356_v13 }
  0xa5   : > { %579 = vmatmul.f32.gmra.mxu0 %v324_v42  ;;  %677 = vmatmul.f32.vlgmr.msrb.gmra.mxu1 %v310_v43  ;;  %v377_v42 = vld [vmem:[%s2216_s16 + $0x220] sm:$0xff] }
  0xa6   : > { %1748 = vmatmul.msk.f32.vlgmr.msra.gmra.mxu3 %vm447_vm1, %v377_v42 }
  0xa9   : > { %1742 = vmatmul.msk.f32.gmra.mxu2 %vm447_vm1, %v359_v17 }
  0xad   : > { %582 = vmatmul.f32.gmra.mxu0 %v327_v44  ;;  %680 = vmatmul.f32.gmra.mxu1 %v313_v45  ;;  %v378_v45 = vld [vmem:[%s2216_s16 + $0x228] sm:$0xff] }
  0xb1   : > { %1743 = vmatmul.msk.f32.gmra.mxu2 %vm447_vm1, %v362_v21  ;;  %v388_v21 = vld [vmem:[%s2216_s16 + $0x278] sm:$0xff] }
  0xb5   : > { %585 = vmatmul.f32.gmra.mxu0 %v330_v46  ;;  %683 = vmatmul.f32.gmra.mxu1 %v316_v47  ;;  %v364_v46 = vld [vmem:[%s2216_s16 + $0x1b8] sm:$0xff] }
  0xb6   : > { %v380_v47 = vld [vmem:[%s2216_s16 + $0x238] sm:$0xff] }
  0xb7   : > { %1749 = vmatmul.msk.f32.gmra.mxu3 %vm447_vm1, %v380_v47 }
  0xb9   : > { %1744 = vmatmul.msk.f32.gmra.mxu2 %vm447_vm1, %v365_v25  ;;  %v404_v25 = vld [vmem:[%s2216_s16 + $0x2f8] sm:$0xff] }
  0xbd   : > { %588 = vmatmul.f32.gmra.mxu0 %v333_v48  ;;  %686 = vmatmul.f32.gmra.mxu1 %v319_v49 }
  0xc1   : > { %1745 = vmatmul.msk.f32.gmra.mxu2 %vm447_vm1, %v368_v29  ;;  %v326_v29 = vld [vmem:[%s2216_s16 + $0x88] sm:$0xff] }
  0xc5   : > { %591 = vmatmul.f32.gmra.mxu0 %v336_v50  ;;  %689 = vmatmul.f32.gmra.mxu1 %v322_v51  ;;  %v381_v50 = vld [vmem:[%s2216_s16 + $0x240] sm:$0xff]  ;;  %v367_v51 = vld [vmem:[%s2216_s16 + $0x1d0] sm:$0xff] }
  0xc9   : > { %1746 = vmatmul.msk.f32.gmra.mxu2 %vm447_vm1, %v371_v33  ;;  %v394_v33 = vld [vmem:[%s2216_s16 + $0x2a8] sm:$0xff] }
  0xcd   : > { %594 = vmatmul.f32.gmra.mxu0 %v339_v52  ;;  %692 = vmatmul.f32.gmra.mxu1 %v325_v53  ;;  %v383_v52 = vld [vmem:[%s2216_s16 + $0x250] sm:$0xff] }
  0xce   : > { %1750 = vmatmul.msk.f32.gmra.mxu3 %vm447_vm1, %v383_v52  ;;  %v403_v52 = vld [vmem:[%s2216_s16 + $0x2f0] sm:$0xff] }
  0xd1   : > { %1747 = vmatmul.msk.f32.gmra.mxu2 %vm447_vm1, %v374_v38 }
  0xd5   : > { %597 = vmatmul.f32.gmra.mxu0 %v342_v58  ;;  %695 = vmatmul.f32.gmra.mxu1 %v328_v59  ;;  %v387_v59 = vld [vmem:[%s2216_s16 + $0x270] sm:$0xff] }
  0xd6   : > { %1751 = vmatmul.msk.f32.gmra.mxu3 %vm447_vm1, %v386_v57  ;;  %v996_v57 = vld [vmem:[%s2896_s2 + $0x68] sm:$0xff] }
  0xdd   : > { %600 = vmatmul.f32.gmra.mxu0 %v345_v63  ;;  %698 = vmatmul.f32.gmra.mxu1 %v331_v0  ;;  %v376_v0 = vld [vmem:[%s2216_s16 + $0x218] sm:$0xff] }
  0xde   : > { %1752 = vmatmul.msk.f32.gmra.mxu3 %vm447_vm1, %v389_v62  ;;  %v994_v62 = vld [vmem:[%s2896_s2 + $0x58] sm:$0xff] }
  0xe5   : > { %603 = vmatmul.f32.gmra.mxu0 %v348_v5  ;;  %701 = vmatmul.f32.gmra.mxu1 %v334_v6  ;;  %v379_v5 = vld [vmem:[%s2216_s16 + $0x230] sm:$0xff]  ;;  %v314_v6 = vld [vmem:[%s2216_s16 + $0x28] sm:$0xff] }
  0xe6   : > { %1753 = vmatmul.msk.f32.gmra.mxu3 %vm447_vm1, %v392_v2  ;;  %v993_v2 = vld [vmem:[%s2896_s2 + $0x50] sm:$0xff] }
  0xed   : > { %606 = vmatmul.f32.gmra.mxu0 %v351_v8  ;;  %704 = vmatmul.f32.gmra.mxu1 %v337_v9 }
  0xee   : > { %1754 = vmatmul.msk.f32.gmra.mxu3 %vm447_vm1, %v395_v7  ;;  %v990_v7 = vld [vmem:[%s2896_s2 + $0x38] sm:$0xff] }
  0xf5   : > { %609 = vmatmul.f32.gmra.mxu0 %v354_v11  ;;  %707 = vmatmul.f32.gmra.mxu1 %v340_v12  ;;  %v317_v11 = vld [vmem:[%s2216_s16 + $0x40] sm:$0xff]  ;;  %v398_v12 = vld [vmem:[%s2216_s16 + $0x2c8] sm:$0xff] }
  0xf6   : > { %1755 = vmatmul.msk.f32.gmra.mxu3 %vm447_vm1, %v398_v12  ;;  %v989_v12 = vld [vmem:[%s2896_s2 + $0x30] sm:$0xff] }
  0xfa   : > { %v2266_v14 = vpop.f32.mrf.mxu0  ;;  %v2300_v37 = vpop.f32.mrf.mxu1 }
  0xfd   : > { %612 = vmatmul.f32.gmra.mxu0 %v357_v15  ;;  %710 = vmatmul.f32.gmra.mxu1 %v343_v16  ;;  %v385_v15 = vld [vmem:[%s2216_s16 + $0x260] sm:$0xff]  ;;  %v320_v16 = vld [vmem:[%s2216_s16 + $0x58] sm:$0xff] }
 0x102   : > { %v2272_v18 = vpop.f32.mrf.mxu0  ;;  %v2310_v43 = vpop.f32.mrf.mxu1 }
 0x105   : > { %615 = vmatmul.f32.gmra.mxu0 %v360_v19  ;;  %713 = vmatmul.f32.gmra.mxu1 %v346_v20  ;;  %v401_v19 = vld [vmem:[%s2216_s16 + $0x2e0] sm:$0xff] }
 0x106   : > { %1756 = vmatmul.msk.f32.gmra.mxu3 %vm447_vm1, %v401_v19  ;;  %v986_v19 = vld [vmem:[%s2896_s2 + $0x18] sm:$0xff] }
 0x10a   : > { %v2278_v22 = vpop.f32.mrf.mxu0  ;;  %v2318_v48 = vpop.f32.mrf.mxu1 }
 0x10d   : > { %618 = vmatmul.f32.gmra.mxu0 %v363_v23  ;;  %716 = vmatmul.f32.gmra.mxu1 %v349_v24  ;;  %v323_v23 = vld [vmem:[%s2216_s16 + $0x70] sm:$0xff] }
 0x10e   : > { %1757 = vmatmul.msk.f32.gmra.mxu3 %vm447_vm1, %v404_v25  ;;  %v984_v25 = vld [vmem:[%s2896_s2 + $0x8] sm:$0xff] }
 0x112   : > { %v2284_v26 = vpop.f32.mrf.mxu0  ;;  %v2330_v56 = vpop.f32.mrf.mxu1 }
 0x115   : > { %621 = vmatmul.f32.gmra.mxu0 %v366_v27  ;;  %719 = vmatmul.f32.gmra.mxu1 %v352_v28  ;;  %v391_v28 = vld [vmem:[%s2216_s16 + $0x290] sm:$0xff] }
 0x11a   : > { %v2290_v30 = vpop.f32.mrf.mxu0  ;;  %v2338_v61 = vpop.f32.mrf.mxu1 }
 0x11d   : > { %624 = vmatmul.f32.gmra.mxu0 %v369_v31  ;;  %722 = vmatmul.f32.gmra.mxu1 %v355_v32 }
 0x122   : > { %v2296_v34 = vpop.f32.mrf.mxu0  ;;  %v2349_v3 = vpop.f32.mrf.mxu1 }
 0x125   : > { %627 = vmatmul.f32.gmra.mxu0 %v372_v35  ;;  %725 = vmatmul.f32.gmra.mxu1 %v358_v36  ;;  %v329_v35 = vld [vmem:[%s2216_s16 + $0xa0] sm:$0xff] }
 0x12a   : > { %v2304_v39 = vpop.f32.mrf.mxu0  ;;  %v2358_v8 = vpop.f32.mrf.mxu1 }
 0x12d   : > { %630 = vmatmul.f32.gmra.mxu0 %v375_v40  ;;  %728 = vmatmul.f32.gmra.mxu1 %v361_v41  ;;  %v397_v40 = vld [vmem:[%s2216_s16 + $0x2c0] sm:$0xff]  ;;  %v332_v41 = vld [vmem:[%s2216_s16 + $0xb8] sm:$0xff] }
 0x132   : > { %v2312_v44 = vpop.f32.mrf.mxu0  ;;  %v2371_v17 = vpop.f32.mrf.mxu1 }
 0x135   : > { %633 = vmatmul.f32.gmra.mxu0 %v378_v45  ;;  %731 = vmatmul.f32.gmra.mxu1 %v364_v46  ;;  %v400_v45 = vld [vmem:[%s2216_s16 + $0x2d8] sm:$0xff]  ;;  %v335_v46 = vld [vmem:[%s2216_s16 + $0xd0] sm:$0xff] }
 0x13a   : > { %v2320_v49 = vpop.f32.mrf.mxu0  ;;  %v2380_v24 = vpop.f32.mrf.mxu1 }
 0x13d   : > { %636 = vmatmul.f32.gmra.mxu0 %v381_v50  ;;  %734 = vmatmul.f32.gmra.mxu1 %v367_v51  ;;  %v998_v50 = vld [vmem:[%s2896_s2 + $0x78] sm:$0xff] }
 0x13e   : > { %999 = vmatpush.msrb.mxu3 %v998_v50 }
 0x142   : > { %v2326_v53 = vpop.f32.mrf.mxu0  ;;  %v2390_v31 = vpop.f32.mrf.mxu1 }
 0x145   : > { %639 = vmatmul.f32.gmra.mxu0 %v384_v54  ;;  %737 = vmatmul.f32.gmra.mxu1 %v370_v55  ;;  %v338_v54 = vld [vmem:[%s2216_s16 + $0xe8] sm:$0xff]  ;;  %v997_v55 = vld [vmem:[%s2896_s2 + $0x70] sm:$0xff] }
 0x146   : > { %1000 = vmatpush.msrb.mxu3 %v997_v55 }
 0x148   : > { %1001 = vmatpush.msrb.mxu3 %v996_v57 }
 0x14a   : > { %v2334_v58 = vpop.f32.mrf.mxu0  ;;  %v2397_v36 = vpop.f32.mrf.mxu1 }
 0x14d   : > { %642 = vmatmul.f32.gmra.mxu0 %v387_v59  ;;  %740 = vmatmul.f32.gmra.mxu1 %v373_v60  ;;  %v995_v60 = vld [vmem:[%s2896_s2 + $0x60] sm:$0xff] }
 0x14e   : > { %1002 = vmatpush.msrb.mxu3 %v995_v60  ;;  %v685_v60 = vadd.f32 %v2371_v17, %v2278_v22 }
 0x150   : > { %1003 = vmatpush.msrb.mxu3 %v994_v62 }
 0x152   : > { %v2342_v63 = vpop.f32.mrf.mxu0  ;;  %v2408_v47 = vpop.f32.mrf.mxu1  ;;  %1004 = vmatpush.msrb.mxu3 %v993_v2 }
 0x155   : > { %743 = vmatmul.f32.gmra.mxu1 %v376_v0  ;;  %1726 = vmatmul.msk.f32.vlgmr.msrb.gmra.mxu0 %vm447_vm1, %v311_v1  ;;  %v341_v1 = vld [vmem:[%s2216_s16 + $0x100] sm:$0xff] }
 0x15a   : > { %v2351_v4 = vpop.f32.mrf.mxu0  ;;  %v2424_v59 = vpop.f32.mrf.mxu1 }
 0x15d   : > { %746 = vmatmul.f32.gmra.mxu1 %v379_v5  ;;  %1727 = vmatmul.msk.f32.gmra.mxu0 %vm447_vm1, %v314_v6  ;;  %v992_v5 = vld [vmem:[%s2896_s2 + $0x48] sm:$0xff]  ;;  %v991_v6 = vld [vmem:[%s2896_s2 + $0x40] sm:$0xff] }
 0x15e   : > { %1005 = vmatpush.msrb.mxu3 %v992_v5  ;;  %v688_v5 = vadd.f32 %v2380_v24, %v2284_v26 }
 0x160   : > { %1006 = vmatpush.msrb.mxu3 %v991_v6 }
 0x162   : > { %v2360_v9 = vpop.f32.mrf.mxu0  ;;  %1007 = vmatpush.msrb.mxu3 %v990_v7 }
 0x164   : > { %1008 = vmatpush.msrb.mxu3 %v989_v12  ;;  %v691_v12 = vadd.f32 %v2390_v31, %v2290_v30 }
 0x165   : > { %749 = vmatmul.f32.gmra.mxu1 %v382_v10  ;;  %1728 = vmatmul.msk.f32.gmra.mxu0 %vm447_vm1, %v317_v11  ;;  %v344_v11 = vld [vmem:[%s2216_s16 + $0x118] sm:$0xff]  ;;  %s297_s16 = scalar_lea.vmem [#allocation7], %s1724_s1 }
 0x16a   : > { %v2367_v13 = vpop.f32.mrf.mxu0 }
 0x16d   : > { %752 = vmatmul.f32.gmra.mxu1 %v385_v15  ;;  %1729 = vmatmul.msk.f32.gmra.mxu0 %vm447_vm1, %v320_v16  ;;  %v988_v15 = vld [vmem:[%s2896_s2 + $0x28] sm:$0xff]  ;;  %v987_v16 = vld [vmem:[%s2896_s2 + $0x20] sm:$0xff] }
 0x16e   : > { %1009 = vmatpush.msrb.mxu3 %v988_v15 }
 0x170   : > { %1010 = vmatpush.msrb.mxu3 %v987_v16 }
 0x172   : > { %v2376_v20 = vpop.f32.mrf.mxu0  ;;  %1011 = vmatpush.msrb.mxu3 %v986_v19 }
 0x175   : > { %755 = vmatmul.f32.gmra.mxu1 %v388_v21  ;;  %1730 = vmatmul.msk.f32.gmra.mxu0 %vm447_vm1, %v323_v23  ;;  %v985_v23 = vld [vmem:[%s2896_s2 + $0x10] sm:$0xff] }
 0x176   : > { %1012 = vmatpush.msrb.mxu3 %v985_v23  ;;  %v694_v23 = vadd.f32 %v2397_v36, %v2296_v34 }
 0x178   : > { %1013 = vmatpush.msrb.mxu3 %v984_v25  ;;  %v2519_v25 = vpop.f32.mrf.mxu3 }
 0x17a   : > { %v2385_v27 = vpop.f32.mrf.mxu0 }
 0x17d   : > { %758 = vmatmul.f32.gmra.mxu1 %v391_v28  ;;  %1731 = vmatmul.msk.f32.gmra.mxu0 %vm447_vm1, %v326_v29  ;;  %v983_v28 = vld [vmem:[%s2896_s2] sm:$0xff] }
 0x17e   : > { %1014 = vmatpush.msrb.mxu3 %v983_v28 }
 0x182   : > { %v2392_v32 = vpop.f32.mrf.mxu0 }
 0x185   : > { %761 = vmatmul.f32.gmra.mxu1 %v394_v33  ;;  %1732 = vmatmul.msk.f32.gmra.mxu0 %vm447_vm1, %v329_v35 }
 0x18a   : > { %v2399_v38 = vpop.f32.mrf.mxu0 }
 0x18d   : > { %764 = vmatmul.f32.gmra.mxu1 %v397_v40  ;;  %1733 = vmatmul.msk.f32.gmra.mxu0 %vm447_vm1, %v332_v41  ;;  %v679_v40 = vadd.f32 %v2349_v3, %v2266_v14 }
 0x192   : > { %v2404_v42 = vpop.f32.mrf.mxu0 }
 0x195   : > { %767 = vmatmul.f32.gmra.mxu1 %v400_v45  ;;  %1734 = vmatmul.msk.f32.gmra.mxu0 %vm447_vm1, %v335_v46 }
 0x19a   : > { %v2414_v51 = vpop.f32.mrf.mxu0 }
 0x19d   : > { %770 = vmatmul.f32.gmra.mxu1 %v403_v52  ;;  %1735 = vmatmul.msk.f32.gmra.mxu0 %vm447_vm1, %v338_v54  ;;  %v682_v52 = vadd.f32 %v2358_v8, %v2272_v18  ;;  %v702_v54 = vpop.f32.mrf.mxu1 }
 0x1a2   : > { %v2433_v0 = vpop.f32.mrf.mxu0 }
 0x1a5   : > { %1736 = vmatmul.msk.f32.gmra.mxu0 %vm447_vm1, %v341_v1  ;;  %v705_v2 = vpop.f32.mrf.mxu1 }
 0x1aa   : > { %v2449_v10 = vpop.f32.mrf.mxu0 }
 0x1ad   : > { %1737 = vmatmul.msk.f32.gmra.mxu0 %vm447_vm1, %v344_v11  ;;  %v708_v17 = vpop.f32.mrf.mxu1 }
 0x1b2   : > { %v2465_v21 = vpop.f32.mrf.mxu0 }
 0x1b5   : > { %v711_v19 = vpop.f32.mrf.mxu1 }
 0x1ba   : > { %v2476_v29 = vpop.f32.mrf.mxu0 }
 0x1c2   : > { %v2478_v33 = vpop.f32.mrf.mxu0 }
 0x1ca   : > { %v2480_v35 = vpop.f32.mrf.mxu0 }
 0x1d2   : > { %v791_v41 = vpop.f32.mrf.mxu0 }
 0x1d3   : > { %v2484_v45 = vadd.f32 %v791_v41, %v679_v40  ;;  %v697_v41 = vadd.f32 %v2408_v47, %v2304_v39 }
 0x1d5   : > { %vm887_vm2 = vcmp.gt.f32.partialorder %v2484_v45, 0.0  ;;  %v919_v46 = vmul.f32 0.01, %v2484_v45 }
 0x1d7   : > { %v951_v50 = vsel %vm887_vm2, %v2484_v45, %v919_v46  ;;  %v714_v46 = vpop.f32.mrf.mxu1 }
 0x1d8   : > { %1015 = vmatmul.f32.vlgmr.msrb.gmra.mxu3 %v951_v50 }
 0x1da   : > { %v794_v55 = vpop.f32.mrf.mxu0 }
 0x1db   : > { %v2491_v57 = vadd.f32 %v794_v55, %v682_v52  ;;  %v2528_v52 = vpop.f32.mrf.mxu3 }
 0x1dd   : > { %vm888_vm3 = vcmp.gt.f32.partialorder %v2491_v57, 0.0  ;;  %v920_v14 = vmul.f32 0.01, %v2491_v57 }
 0x1df   : > { %v952_v3 = vsel %vm888_vm3, %v2491_v57, %v920_v14  ;;  %v700_v14 = vadd.f32 %v2424_v59, %v2312_v44  ;;  %v717_v39 = vpop.f32.mrf.mxu1 }
 0x1e0   : > { %1018 = vmatmul.f32.gmra.mxu3 %v952_v3 }
 0x1e2   : > { %v797_v62 = vpop.f32.mrf.mxu0 }
 0x1e3   : > { %v2498_v1 = vadd.f32 %v797_v62, %v685_v60  ;;  %v2539_v47 = vpop.f32.mrf.mxu3 }
 0x1e5   : > { %vm889_vm4 = vcmp.gt.f32.partialorder %v2498_v1, 0.0  ;;  %v921_v18 = vmul.f32 0.01, %v2498_v1 }
 0x1e7   : > { %v953_v8 = vsel %vm889_vm4, %v2498_v1, %v921_v18  ;;  %v720_v59 = vpop.f32.mrf.mxu1 }
 0x1e8   : > { %1021 = vmatmul.f32.gmra.mxu3 %v953_v8  ;;  %v703_v8 = vadd.f32 %v702_v54, %v2320_v49 }
 0x1ea   : > { %v800_v6 = vpop.f32.mrf.mxu0 }
 0x1eb   : > { %v2505_v7 = vadd.f32 %v800_v6, %v688_v5 }
 0x1ed   : > { %vm890_vm5 = vcmp.gt.f32.partialorder %v2505_v7, 0.0  ;;  %v922_v22 = vmul.f32 0.01, %v2505_v7 }
 0x1ef   : > { %v954_v11 = vsel %vm890_vm5, %v2505_v7, %v922_v22  ;;  %v2549_v22 = vpop.f32.mrf.mxu3  ;;  %vm1211_vm5 = vcmask 162816  }
 0x1f0   : > { %1024 = vmatmul.f32.gmra.mxu3 %v954_v11 }
 0x1f2   : > { %v803_v15 = vpop.f32.mrf.mxu0 }
 0x1f3   : > { %v2512_v16 = vadd.f32 %v803_v15, %v691_v12  ;;  %v706_v12 = vadd.f32 %v705_v2, %v2326_v53  ;;  %v827_v15 = vpop.f32.mrf.mxu2 }
 0x1f5   : > { %vm891_vm6 = vcmp.gt.f32.partialorder %v2512_v16, 0.0  ;;  %v923_v26 = vmul.f32 0.01, %v2512_v16 }
 0x1f7   : > { %v955_v24 = vsel %vm891_vm6, %v2512_v16, %v923_v26 }
 0x1f8   : > { %1027 = vmatmul.f32.gmra.mxu3 %v955_v24 }
 0x1fa   : > { %v806_v28 = vpop.f32.mrf.mxu0 }
 0x1fb   : > { %v2521_v40 = vadd.f32 %v806_v28, %v694_v23  ;;  %v723_v23 = vpop.f32.mrf.mxu1  ;;  %v709_v28 = vadd.f32 %v708_v17, %v2334_v58  ;;  %v830_v53 = vpop.f32.mrf.mxu2 }
 0x1fd   : > { %vm892_vm7 = vcmp.gt.f32.partialorder %v2521_v40, 0.0  ;;  %v924_v30 = vmul.f32 0.01, %v2521_v40 }
 0x1ff   : > { %v956_v31 = vsel %vm892_vm7, %v2521_v40, %v924_v30  ;;  %v2559_v30 = vpop.f32.mrf.mxu3 }
 0x200   : > { %1030 = vmatmul.f32.gmra.mxu3 %v956_v31 }
 0x202   : > { %v809_v50 = vpop.f32.mrf.mxu0 }
 0x203   : > { %v2530_v34 = vadd.f32 %v809_v50, %v697_v41 }
 0x205   : > { %vm893_vm8 = vcmp.gt.f32.partialorder %v2530_v34, 0.0  ;;  %v925_v36 = vmul.f32 0.01, %v2530_v34 }
 0x207   : > { %v957_v55 = vsel %vm893_vm8, %v2530_v34, %v925_v36  ;;  %v712_v36 = vadd.f32 %v711_v19, %v2342_v63  ;;  %v2568_v58 = vpop.f32.mrf.mxu3  ;;  %v718_v63 = vadd.f32 %v717_v39, %v2360_v9  ;;  %v721_v9 = vadd.f32 %v720_v59, %v2367_v13 }
 0x208   : > { %1033 = vmatmul.f32.gmra.mxu3 %v957_v55  ;;  %v726_v55 = vpop.f32.mrf.mxu1 }
 0x20a   : > { %v812_v3 = vpop.f32.mrf.mxu0 }
 0x20b   : > { %v2537_v60 = vadd.f32 %v812_v3, %v700_v14  ;;  %v715_v3 = vadd.f32 %v714_v46, %v2351_v4  ;;  %v2582_v46 = vadd.f32 %v830_v53, %v718_v63  ;;  %v724_v53 = vadd.f32 %v723_v23, %v2376_v20 }
 0x20d   : > { %vm894_vm9 = vcmp.gt.f32.partialorder %v2537_v60, 0.0  ;;  %v926_v62 = vmul.f32 0.01, %v2537_v60  ;;  %v932_v39 = vmul.f32 0.01, %v2582_v46  ;;  %vm900_vm0 = vcmp.gt.f32.partialorder %v2582_v46, 0.0 }
 0x20f   : > { %v958_v18 = vsel %vm894_vm9, %v2537_v60, %v926_v62  ;;  %v2580_v4 = vpop.f32.mrf.mxu3  ;;  %v964_v13 = vsel %vm900_vm0, %v2582_v46, %v932_v39 }
 0x210   : > { %1036 = vmatmul.f32.gmra.mxu3 %v958_v18  ;;  %v833_v18 = vpop.f32.mrf.mxu2 }
 0x212   : > { %v815_v5 = vpop.f32.mrf.mxu0 }
 0x213   : > { %v2545_v6 = vadd.f32 %v815_v5, %v703_v8  ;;  %v2574_v8 = vadd.f32 %v827_v15, %v715_v3  ;;  %v1210_v15 = vld [vmem:[%s2897_s3 + $0x10] sm:$0xf] }
 0x214   : > { %1758 = vmatpush.msk.msrb.mxu2 %vm1308_vm15, %v1210_v15 }
 0x215   : > { %vm895_vm10 = vcmp.gt.f32.partialorder %v2545_v6, 0.0  ;;  %v927_v44 = vmul.f32 0.01, %v2545_v6  ;;  %v931_v19 = vmul.f32 0.01, %v2574_v8  ;;  %vm899_vm14 = vcmp.gt.f32.partialorder %v2574_v8, 0.0 }
 0x217   : > { %v959_v11 = vsel %vm895_vm10, %v2545_v6, %v927_v44  ;;  %v729_v44 = vpop.f32.mrf.mxu1 }
 0x218   : > { %1039 = vmatmul.f32.gmra.mxu3 %v959_v11  ;;  %v963_v11 = vsel %vm899_vm14, %v2574_v8, %v931_v19  ;;  %v730_v19 = vadd.f32 %v729_v44, %v2392_v32 }
 0x21a   : > { %v818_v26 = vpop.f32.mrf.mxu0 }
 0x21b   : > { %v2553_v24 = vadd.f32 %v818_v26, %v706_v12  ;;  %v836_v12 = vpop.f32.mrf.mxu2  ;;  %v1209_v26 = vld [vmem:[%s2897_s3 + $0x8] sm:$0xff] }
 0x21c   : > { %1326 = vmatpush.msrb.mxu2 %v1209_v26 }
 0x21d   : > { %vm896_vm11 = vcmp.gt.f32.partialorder %v2553_v24, 0.0  ;;  %v928_v49 = vmul.f32 0.01, %v2553_v24 }
 0x21f   : > { %v960_v54 = vsel %vm896_vm11, %v2553_v24, %v928_v49  ;;  %v1208_v49 = vld [vmem:[%s2897_s3] sm:$0xff] }
 0x220   : > { %1042 = vmatmul.f32.gmra.mxu3 %v960_v54  ;;  %v732_v54 = vpop.f32.mrf.mxu1  ;;  %1327 = vmatpush.msrb.mxu2 %v1208_v49 }
 0x222   : > { %v821_v31 = vpop.f32.mrf.mxu0 }
 0x223   : > { %v2561_v41 = vadd.f32 %v821_v31, %v709_v28  ;;  %v2597_v28 = vadd.f32 %v833_v18, %v721_v9  ;;  %v2599_v31 = vpop.f32.mrf.mxu3  ;;  %v839_v59 = vpop.f32.mrf.mxu2  ;;  %v733_v9 = vadd.f32 %v732_v54, %v2399_v38 }
 0x225   : > { %vm897_vm12 = vcmp.gt.f32.partialorder %v2561_v41, 0.0  ;;  %v929_v2 = vmul.f32 0.01, %v2561_v41  ;;  %vm901_vm1 = vcmp.gt.f32.partialorder %v2597_v28, 0.0 }
 0x227   : > { %v961_v50 = vsel %vm897_vm12, %v2561_v41, %v929_v2  ;;  %v933_v2 = vmul.f32 0.01, %v2597_v28 }
 0x228   : > { %1045 = vmatmul.f32.gmra.mxu3 %v961_v50  ;;  %v2605_v50 = vadd.f32 %v836_v12, %v724_v53 }
 0x22a   : > { %v824_v14 = vpop.f32.mrf.mxu0  ;;  %v934_v18 = vmul.f32 0.01, %v2605_v50  ;;  %vm902_vm2 = vcmp.gt.f32.partialorder %v2605_v50, 0.0 }
 0x22b   : > { %v2570_v17 = vadd.f32 %v824_v14, %v712_v36  ;;  %v965_v36 = vsel %vm901_vm1, %v2597_v28, %v933_v2  ;;  %v735_v14 = vpop.f32.mrf.mxu1  ;;  %v2608_v3 = vpop.f32.mrf.mxu3 }
 0x22c   : > { %v966_v23 = vsel %vm902_vm2, %v2605_v50, %v934_v18  ;;  %v736_v38 = vadd.f32 %v735_v14, %v2404_v42 }
 0x22d   : > { %vm898_vm13 = vcmp.gt.f32.partialorder %v2570_v17, 0.0  ;;  %v930_v62 = vmul.f32 0.01, %v2570_v17 }
 0x22f   : > { %v962_v5 = vsel %vm898_vm13, %v2570_v17, %v930_v62  ;;  %v727_v62 = vadd.f32 %v726_v55, %v2385_v27 }
 0x230   : > { %1048 = vmatmul.f32.gmra.mxu3 %v962_v5  ;;  %v842_v5 = vpop.f32.mrf.mxu2 }
 0x231   : > { %v2613_v20 = vadd.f32 %v839_v59, %v727_v62  ;;  %v2621_v55 = vadd.f32 %v842_v5, %v730_v19 }
 0x233   : > { %v738_v63 = vpop.f32.mrf.mxu1  ;;  %v935_v12 = vmul.f32 0.01, %v2613_v20  ;;  %vm903_vm3 = vcmp.gt.f32.partialorder %v2613_v20, 0.0  ;;  %v936_v26 = vmul.f32 0.01, %v2621_v55  ;;  %vm904_vm6 = vcmp.gt.f32.partialorder %v2621_v55, 0.0 }
 0x235   : > { %v967_v15 = vsel %vm903_vm3, %v2613_v20, %v935_v12  ;;  %v968_v59 = vsel %vm904_vm6, %v2621_v55, %v936_v26  ;;  %v739_v12 = vadd.f32 %v738_v63, %v2414_v51 }
 0x238   : > { %1051 = vmatmul.f32.gmra.mxu3 %v963_v11  ;;  %v2617_v11 = vpop.f32.mrf.mxu3  ;;  %v845_v27 = vpop.f32.mrf.mxu2 }
 0x239   : > { %v2627_v44 = vadd.f32 %v845_v27, %v733_v9 }
 0x23b   : > { %v741_v49 = vpop.f32.mrf.mxu1  ;;  %v937_v2 = vmul.f32 0.01, %v2627_v44  ;;  %vm905_vm8 = vcmp.gt.f32.partialorder %v2627_v44, 0.0 }
 0x240   : > { %1054 = vmatmul.f32.gmra.mxu3 %v964_v13  ;;  %v848_v53 = vpop.f32.mrf.mxu2 }
 0x241   : > { %v2634_v5 = vadd.f32 %v848_v53, %v736_v38 }
 0x243   : > { %v744_v62 = vpop.f32.mrf.mxu1  ;;  %v938_v14 = vmul.f32 0.01, %v2634_v5  ;;  %vm906_vm10 = vcmp.gt.f32.partialorder %v2634_v5, 0.0 }
 0x248   : > { %1057 = vmatmul.f32.gmra.mxu3 %v965_v36  ;;  %v851_v19 = vpop.f32.mrf.mxu2 }
 0x249   : > { %v2641_v9 = vadd.f32 %v851_v19, %v739_v12 }
 0x24b   : > { %v747_v26 = vpop.f32.mrf.mxu1  ;;  %v939_v51 = vmul.f32 0.01, %v2641_v9  ;;  %vm907_vm12 = vcmp.gt.f32.partialorder %v2641_v9, 0.0 }
 0x250   : > { %1060 = vmatmul.f32.gmra.mxu3 %v966_v23  ;;  %v969_v23 = vsel %vm905_vm8, %v2627_v44, %v937_v2  ;;  %v854_v63 = vpop.f32.mrf.mxu2 }
 0x253   : > { %v750_v2 = vpop.f32.mrf.mxu1 }
 0x258   : > { %1063 = vmatmul.f32.gmra.mxu3 %v967_v15 }
 0x25b   : > { %v1016_v39 = vpop.f32.mrf.mxu3 }
 0x25c   : > { %v1144_v13 = vmul.f32 0.01, %v1016_v39  ;;  %vm1112_vm4 = vcmp.gt.f32.partialorder %v1016_v39, 0.0 }
 0x25e   : > { %v1176_v32 = vsel %vm1112_vm4, %v1016_v39, %v1144_v13  ;;  %v970_v39 = vsel %vm906_vm10, %v2634_v5, %v938_v14  ;;  %v742_v13 = vadd.f32 %v741_v49, %v2433_v0 }
 0x25f   : > { %1759 = vmatmul.msk.f32.vlgmr.msrb.gmra.mxu2 %vm1211_vm5, %v1176_v32 }
 0x260   : > { %1066 = vmatmul.f32.gmra.mxu3 %v968_v59  ;;  %v2648_v38 = vadd.f32 %v854_v63, %v742_v13  ;;  %v751_v13 = vadd.f32 %v750_v2, %v2476_v29 }
 0x262   : > { %v940_v49 = vmul.f32 0.01, %v2648_v38  ;;  %vm908_vm14 = vcmp.gt.f32.partialorder %v2648_v38, 0.0 }
 0x263   : > { %v1019_v54 = vpop.f32.mrf.mxu3 }
 0x264   : > { %v1145_v36 = vmul.f32 0.01, %v1019_v54  ;;  %vm1113_vm7 = vcmp.gt.f32.partialorder %v1019_v54, 0.0  ;;  %v972_v12 = vsel %vm908_vm14, %v2648_v38, %v940_v49 }
 0x266   : > { %v1177_v18 = vsel %vm1113_vm7, %v1019_v54, %v1145_v36  ;;  %v971_v54 = vsel %vm907_vm12, %v2641_v9, %v939_v51  ;;  %v745_v36 = vadd.f32 %v744_v62, %v2449_v10  ;;  %v753_v62 = vpop.f32.mrf.mxu1 }
 0x267   : > { %1760 = vmatmul.msk.f32.gmra.mxu2 %vm1211_vm5, %v1177_v18 }
 0x268   : > { %1069 = vmatmul.f32.gmra.mxu3 %v969_v23  ;;  %v2656_v19 = vadd.f32 %v2519_v25, %v745_v36 }
 0x26a   : > { %v941_v10 = vmul.f32 0.01, %v2656_v19  ;;  %vm909_vm0 = vcmp.gt.f32.partialorder %v2656_v19, 0.0 }
 0x26b   : > { %v1022_v42 = vpop.f32.mrf.mxu3 }
 0x26c   : > { %v1146_v27 = vmul.f32 0.01, %v1022_v42  ;;  %vm1114_vm9 = vcmp.gt.f32.partialorder %v1022_v42, 0.0  ;;  %v973_v25 = vsel %vm909_vm0, %v2656_v19, %v941_v10 }
 0x26e   : > { %v1178_v15 = vsel %vm1114_vm9, %v1022_v42, %v1146_v27  ;;  %v748_v42 = vadd.f32 %v747_v26, %v2465_v21  ;;  %v756_v51 = vpop.f32.mrf.mxu1 }
 0x26f   : > { %1761 = vmatmul.msk.f32.gmra.mxu2 %vm1211_vm5, %v1178_v15 }
 0x270   : > { %1072 = vmatmul.f32.gmra.mxu3 %v970_v39  ;;  %v2664_v39 = vadd.f32 %v2528_v52, %v748_v42 }
 0x272   : > { %v942_v26 = vmul.f32 0.01, %v2664_v39  ;;  %vm910_vm2 = vcmp.gt.f32.partialorder %v2664_v39, 0.0 }
 0x273   : > { %v1025_v32 = vpop.f32.mrf.mxu3 }
 0x274   : > { %v1147_v59 = vmul.f32 0.01, %v1025_v32  ;;  %vm1115_vm11 = vcmp.gt.f32.partialorder %v1025_v32, 0.0  ;;  %v974_v52 = vsel %vm910_vm2, %v2664_v39, %v942_v26 }
 0x276   : > { %v1179_v53 = vsel %vm1115_vm11, %v1025_v32, %v1147_v59  ;;  %v2672_v59 = vadd.f32 %v2539_v47, %v751_v13  ;;  %v759_v49 = vpop.f32.mrf.mxu1 }
 0x277   : > { %1762 = vmatmul.msk.f32.gmra.mxu2 %vm1211_vm5, %v1179_v53  ;;  %v754_v53 = vadd.f32 %v753_v62, %v2478_v33  ;;  %v760_v62 = vadd.f32 %v759_v49, %v2300_v37 }
 0x278   : > { %1075 = vmatmul.f32.gmra.mxu3 %v971_v54  ;;  %v943_v54 = vmul.f32 0.01, %v2672_v59  ;;  %vm911_vm4 = vcmp.gt.f32.partialorder %v2672_v59, 0.0 }
 0x279   : > { %v2696_v13 = vadd.f32 %v2568_v58, %v760_v62 }
 0x27a   : > { %v975_v47 = vsel %vm911_vm4, %v2672_v59, %v943_v54 }
 0x27b   : > { %v1028_v0 = vpop.f32.mrf.mxu3  ;;  %v946_v37 = vmul.f32 0.01, %v2696_v13  ;;  %vm914_vm11 = vcmp.gt.f32.partialorder %v2696_v13, 0.0 }
 0x27c   : > { %v1148_v18 = vmul.f32 0.01, %v1028_v0  ;;  %vm1116_vm13 = vcmp.gt.f32.partialorder %v1028_v0, 0.0 }
 0x27d   : > { %v978_v58 = vsel %vm914_vm11, %v2696_v13, %v946_v37 }
 0x27e   : > { %v1180_v23 = vsel %vm1116_vm13, %v1028_v0, %v1148_v18  ;;  %v2680_v0 = vadd.f32 %v2549_v22, %v754_v53  ;;  %v757_v18 = vadd.f32 %v756_v51, %v2480_v35  ;;  %v762_v10 = vpop.f32.mrf.mxu1 }
 0x27f   : > { %1763 = vmatmul.msk.f32.gmra.mxu2 %vm1211_vm5, %v1180_v23 }
 0x280   : > { %1078 = vmatmul.f32.gmra.mxu3 %v972_v12  ;;  %v944_v23 = vmul.f32 0.01, %v2680_v0  ;;  %vm912_vm7 = vcmp.gt.f32.partialorder %v2680_v0, 0.0 }
 0x282   : > { %v976_v22 = vsel %vm912_vm7, %v2680_v0, %v944_v23 }
 0x283   : > { %v1031_v14 = vpop.f32.mrf.mxu3 }
 0x284   : > { %v1149_v27 = vmul.f32 0.01, %v1031_v14  ;;  %vm1117_vm15 = vcmp.gt.f32.partialorder %v1031_v14, 0.0 }
 0x286   : > { %v1181_v15 = vsel %vm1117_vm15, %v1031_v14, %v1149_v27  ;;  %v2688_v14 = vadd.f32 %v2559_v30, %v757_v18 }
 0x287   : > { %1764 = vmatmul.msk.f32.gmra.mxu2 %vm1211_vm5, %v1181_v15 }
 0x288   : > { %1081 = vmatmul.f32.gmra.mxu3 %v973_v25  ;;  %v945_v27 = vmul.f32 0.01, %v2688_v14  ;;  %vm913_vm9 = vcmp.gt.f32.partialorder %v2688_v14, 0.0 }
 0x28a   : > { %v977_v30 = vsel %vm913_vm9, %v2688_v14, %v945_v27 }
 0x28b   : > { %v1034_v21 = vpop.f32.mrf.mxu3 }
 0x28c   : > { %v1150_v32 = vmul.f32 0.01, %v1034_v21  ;;  %vm1118_vm1 = vcmp.gt.f32.partialorder %v1034_v21, 0.0 }
 0x28e   : > { %v1182_v63 = vsel %vm1118_vm1, %v1034_v21, %v1150_v32  ;;  %v763_v21 = vadd.f32 %v762_v10, %v2310_v43  ;;  %v765_v32 = vpop.f32.mrf.mxu1 }
 0x28f   : > { %1765 = vmatmul.msk.f32.gmra.mxu2 %vm1211_vm5, %v1182_v63  ;;  %v766_v53 = vadd.f32 %v765_v32, %v2318_v48 }
 0x290   : > { %1084 = vmatmul.f32.gmra.mxu3 %v974_v52  ;;  %v2704_v52 = vadd.f32 %v2580_v4, %v763_v21 }
 0x292   : > { %vm915_vm13 = vcmp.gt.f32.partialorder %v2704_v52, 0.0 }
 0x293   : > { %v1037_v29 = vpop.f32.mrf.mxu3 }
 0x294   : > { %v1151_v2 = vmul.f32 0.01, %v1037_v29  ;;  %vm1119_vm3 = vcmp.gt.f32.partialorder %v1037_v29, 0.0 }
 0x296   : > { %v1183_v36 = vsel %vm1119_vm3, %v1037_v29, %v1151_v2  ;;  %v947_v29 = vmul.f32 0.01, %v2704_v52  ;;  %v768_v2 = vpop.f32.mrf.mxu1 }
 0x297   : > { %1766 = vmatmul.msk.f32.gmra.mxu2 %vm1211_vm5, %v1183_v36  ;;  %v769_v49 = vadd.f32 %v768_v2, %v2330_v56 }
 0x298   : > { %1087 = vmatmul.f32.gmra.mxu3 %v975_v47  ;;  %v2712_v47 = vadd.f32 %v2599_v31, %v766_v53  ;;  %v979_v4 = vsel %vm915_vm13, %v2704_v52, %v947_v29 }
 0x29a   : > { %v948_v18 = vmul.f32 0.01, %v2712_v47  ;;  %vm916_vm15 = vcmp.gt.f32.partialorder %v2712_v47, 0.0 }
 0x29b   : > { %v1040_v33 = vpop.f32.mrf.mxu3 }
 0x29c   : > { %vm1120_vm6 = vcmp.gt.f32.partialorder %v1040_v33, 0.0  ;;  %v1152_v12 = vmul.f32 0.01, %v1040_v33  ;;  %v980_v31 = vsel %vm916_vm15, %v2712_v47, %v948_v18 }
 0x29e   : > { %v1184_v42 = vsel %vm1120_vm6, %v1040_v33, %v1152_v12  ;;  %v2720_v12 = vadd.f32 %v2608_v3, %v769_v49 }
 0x29f   : > { %1767 = vmatmul.msk.f32.gmra.mxu2 %vm1211_vm5, %v1184_v42  ;;  %v771_v42 = vpop.f32.mrf.mxu1 }
 0x2a0   : > { %1090 = vmatmul.f32.gmra.mxu3 %v976_v22  ;;  %v772_v22 = vadd.f32 %v771_v42, %v2338_v61  ;;  %v949_v10 = vmul.f32 0.01, %v2720_v12  ;;  %vm917_vm1 = vcmp.gt.f32.partialorder %v2720_v12, 0.0 }
 0x2a2   : > { %v2728_v27 = vadd.f32 %v2617_v11, %v772_v22  ;;  %v981_v3 = vsel %vm917_vm1, %v2720_v12, %v949_v10 }
 0x2a3   : > { %v1043_v35 = vpop.f32.mrf.mxu3 }
 0x2a4   : > { %vm1121_vm8 = vcmp.gt.f32.partialorder %v1043_v35, 0.0  ;;  %v1153_v15 = vmul.f32 0.01, %v1043_v35  ;;  %vm918_vm3 = vcmp.gt.f32.partialorder %v2728_v27, 0.0 }
 0x2a6   : > { %v1185_v25 = vsel %vm1121_vm8, %v1043_v35, %v1153_v15 }
 0x2a7   : > { %1768 = vmatmul.msk.f32.gmra.mxu2 %vm1211_vm5, %v1185_v25  ;;  %v950_v25 = vmul.f32 0.01, %v2728_v27 }
 0x2a8   : > { %1093 = vmatmul.f32.gmra.mxu3 %v977_v30 }
 0x2a9   : > { %v982_v21 = vsel %vm918_vm3, %v2728_v27, %v950_v25 }
 0x2ab   : > { %v1046_v26 = vpop.f32.mrf.mxu3 }
 0x2ac   : > { %vm1122_vm10 = vcmp.gt.f32.partialorder %v1046_v26, 0.0  ;;  %v1154_v51 = vmul.f32 0.01, %v1046_v26 }
 0x2ae   : > { %v1186_v63 = vsel %vm1122_vm10, %v1046_v26, %v1154_v51 }
 0x2af   : > { %1769 = vmatmul.msk.f32.gmra.mxu2 %vm1211_vm5, %v1186_v63 }
 0x2b0   : > { %1096 = vmatmul.f32.gmra.mxu3 %v978_v58 }
 0x2b3   : > { %v1049_v43 = vpop.f32.mrf.mxu3 }
 0x2b4   : > { %vm1123_vm12 = vcmp.gt.f32.partialorder %v1049_v43, 0.0  ;;  %v1155_v54 = vmul.f32 0.01, %v1049_v43 }
 0x2b6   : > { %v1187_v36 = vsel %vm1123_vm12, %v1049_v43, %v1155_v54 }
 0x2b7   : > { %1770 = vmatmul.msk.f32.gmra.mxu2 %vm1211_vm5, %v1187_v36 }
 0x2b8   : > { %1099 = vmatmul.f32.gmra.mxu3 %v979_v4 }
 0x2bb   : > { %v1052_v48 = vpop.f32.mrf.mxu3 }
 0x2bc   : > { %vm1124_vm14 = vcmp.gt.f32.partialorder %v1052_v48, 0.0  ;;  %v1156_v33 = vmul.f32 0.01, %v1052_v48 }
 0x2be   : > { %v1188_v23 = vsel %vm1124_vm14, %v1052_v48, %v1156_v33 }
 0x2bf   : > { %1771 = vmatmul.msk.f32.gmra.mxu2 %vm1211_vm5, %v1188_v23 }
 0x2c0   : > { %1102 = vmatmul.f32.gmra.mxu3 %v980_v31 }
 0x2c3   : > { %v1055_v56 = vpop.f32.mrf.mxu3 }
 0x2c4   : > { %vm1125_vm0 = vcmp.gt.f32.partialorder %v1055_v56, 0.0  ;;  %v1157_v62 = vmul.f32 0.01, %v1055_v56 }
 0x2c6   : > { %v1189_v35 = vsel %vm1125_vm0, %v1055_v56, %v1157_v62 }
 0x2c7   : > { %1772 = vmatmul.msk.f32.gmra.mxu2 %vm1211_vm5, %v1189_v35 }
 0x2c8   : > { %1105 = vmatmul.f32.gmra.mxu3 %v981_v3 }
 0x2cb   : > { %v1058_v15 = vpop.f32.mrf.mxu3 }
 0x2cc   : > { %vm1126_vm2 = vcmp.gt.f32.partialorder %v1058_v15, 0.0  ;;  %v1158_v61 = vmul.f32 0.01, %v1058_v15 }
 0x2ce   : > { %v1190_v30 = vsel %vm1126_vm2, %v1058_v15, %v1158_v61 }
 0x2cf   : > { %1773 = vmatmul.msk.f32.gmra.mxu2 %vm1211_vm5, %v1190_v30 }
 0x2d0   : > { %1108 = vmatmul.f32.gmra.mxu3 %v982_v21 }
 0x2d3   : > { %v1061_v11 = vpop.f32.mrf.mxu3 }
 0x2d4   : > { %vm1127_vm4 = vcmp.gt.f32.partialorder %v1061_v11, 0.0  ;;  %v1159_v26 = vmul.f32 0.01, %v1061_v11 }
 0x2d6   : > { %v1191_v37 = vsel %vm1127_vm4, %v1061_v11, %v1159_v26 }
 0x2d7   : > { %1774 = vmatmul.msk.f32.gmra.mxu2 %vm1211_vm5, %v1191_v37 }
 0x2db   : > { %v1064_v32 = vpop.f32.mrf.mxu3 }
 0x2dc   : > { %vm1128_vm6 = vcmp.gt.f32.partialorder %v1064_v32, 0.0  ;;  %v1160_v51 = vmul.f32 0.01, %v1064_v32 }
 0x2de   : > { %v1192_v63 = vsel %vm1128_vm6, %v1064_v32, %v1160_v51 }
 0x2df   : > { %1775 = vmatmul.msk.f32.gmra.mxu2 %vm1211_vm5, %v1192_v63 }
 0x2e2   : > { %v2738_v58 = vpop.f32.mrf.mxu2 }
 0x2e3   : > { %v1067_v53 = vpop.f32.mrf.mxu3 }
 0x2e4   : > { %vm1129_vm7 = vcmp.gt.f32.partialorder %v1067_v53, 0.0  ;;  %v1161_v43 = vmul.f32 0.01, %v1067_v53 }
 0x2e6   : > { %v1193_v29 = vsel %vm1129_vm7, %v1067_v53, %v1161_v43 }
 0x2e7   : > { %1776 = vmatmul.msk.f32.gmra.mxu2 %vm1211_vm5, %v1193_v29 }
 0x2ea   : > { %v2741_v54 = vpop.f32.mrf.mxu2 }
 0x2eb   : > { %v1070_v2 = vpop.f32.mrf.mxu3 }
 0x2ec   : > { %vm1130_vm8 = vcmp.gt.f32.partialorder %v1070_v2, 0.0  ;;  %v1162_v36 = vmul.f32 0.01, %v1070_v2 }
 0x2ee   : > { %v1194_v4 = vsel %vm1130_vm8, %v1070_v2, %v1162_v36 }
 0x2ef   : > { %1777 = vmatmul.msk.f32.gmra.mxu2 %vm1211_vm5, %v1194_v4 }
 0x2f2   : > { %v2744_v49 = vpop.f32.mrf.mxu2 }
 0x2f3   : > { %v1073_v48 = vpop.f32.mrf.mxu3 }
 0x2f4   : > { %vm1131_vm9 = vcmp.gt.f32.partialorder %v1073_v48, 0.0  ;;  %v1163_v18 = vmul.f32 0.01, %v1073_v48 }
 0x2f6   : > { %v1195_v33 = vsel %vm1131_vm9, %v1073_v48, %v1163_v18 }
 0x2f7   : > { %1778 = vmatmul.msk.f32.gmra.mxu2 %vm1211_vm5, %v1195_v33 }
 0x2fa   : > { %v2747_v23 = vpop.f32.mrf.mxu2 }
 0x2fb   : > { %v1076_v31 = vpop.f32.mrf.mxu3 }
 0x2fc   : > { %vm1132_vm10 = vcmp.gt.f32.partialorder %v1076_v31, 0.0  ;;  %v1164_v42 = vmul.f32 0.01, %v1076_v31 }
 0x2fe   : > { %v1196_v22 = vsel %vm1132_vm10, %v1076_v31, %v1164_v42 }
 0x2ff   : > { %1779 = vmatmul.msk.f32.gmra.mxu2 %vm1211_vm5, %v1196_v22 }
 0x302   : > { %v2750_v56 = vpop.f32.mrf.mxu2 }
 0x303   : > { %v1079_v10 = vpop.f32.mrf.mxu3 }
 0x304   : > { %vm1133_vm11 = vcmp.gt.f32.partialorder %v1079_v10, 0.0  ;;  %v1165_v62 = vmul.f32 0.01, %v1079_v10 }
 0x306   : > { %v1197_v35 = vsel %vm1133_vm11, %v1079_v10, %v1165_v62 }
 0x307   : > { %1780 = vmatmul.msk.f32.gmra.mxu2 %vm1211_vm5, %v1197_v35 }
 0x30a   : > { %v2753_v3 = vpop.f32.mrf.mxu2 }
 0x30b   : > { %v1082_v15 = vpop.f32.mrf.mxu3 }
 0x30c   : > { %vm1134_vm12 = vcmp.gt.f32.partialorder %v1082_v15, 0.0  ;;  %v1166_v25 = vmul.f32 0.01, %v1082_v15 }
 0x30e   : > { %v1198_v61 = vsel %vm1134_vm12, %v1082_v15, %v1166_v25 }
 0x30f   : > { %1781 = vmatmul.msk.f32.gmra.mxu2 %vm1211_vm5, %v1198_v61 }
 0x312   : > { %v2756_v30 = vpop.f32.mrf.mxu2 }
 0x313   : > { %v1085_v21 = vpop.f32.mrf.mxu3 }
 0x314   : > { %vm1135_vm13 = vcmp.gt.f32.partialorder %v1085_v21, 0.0  ;;  %v1167_v11 = vmul.f32 0.01, %v1085_v21 }
 0x316   : > { %v1199_v26 = vsel %vm1135_vm13, %v1085_v21, %v1167_v11 }
 0x317   : > { %1782 = vmatmul.msk.f32.gmra.mxu2 %vm1211_vm5, %v1199_v26 }
 0x31a   : > { %v2759_v37 = vpop.f32.mrf.mxu2 }
 0x31b   : > { %v1088_v32 = vpop.f32.mrf.mxu3 }
 0x31c   : > { %vm1136_vm14 = vcmp.gt.f32.partialorder %v1088_v32, 0.0  ;;  %v1168_v51 = vmul.f32 0.01, %v1088_v32 }
 0x31e   : > { %v1200_v63 = vsel %vm1136_vm14, %v1088_v32, %v1168_v51 }
 0x31f   : > { %1783 = vmatmul.msk.f32.gmra.mxu2 %vm1211_vm5, %v1200_v63 }
 0x322   : > { %v2762_v53 = vpop.f32.mrf.mxu2 }
 0x323   : > { %v1091_v43 = vpop.f32.mrf.mxu3 }
 0x324   : > { %vm1137_vm15 = vcmp.gt.f32.partialorder %v1091_v43, 0.0  ;;  %v1169_v29 = vmul.f32 0.01, %v1091_v43 }
 0x326   : > { %v1201_v2 = vsel %vm1137_vm15, %v1091_v43, %v1169_v29 }
 0x327   : > { %1784 = vmatmul.msk.f32.gmra.mxu2 %vm1211_vm5, %v1201_v2 }
 0x32a   : > { %v2765_v36 = vpop.f32.mrf.mxu2 }
 0x32b   : > { %v1094_v4 = vpop.f32.mrf.mxu3 }
 0x32c   : > { %vm1138_vm0 = vcmp.gt.f32.partialorder %v1094_v4, 0.0  ;;  %v1170_v48 = vmul.f32 0.01, %v1094_v4 }
 0x32e   : > { %v1202_v18 = vsel %vm1138_vm0, %v1094_v4, %v1170_v48 }
 0x32f   : > { %1785 = vmatmul.msk.f32.gmra.mxu2 %vm1211_vm5, %v1202_v18 }
 0x332   : > { %v1359_v33 = vpop.f32.mrf.mxu2 }
 0x333   : > { %v1097_v31 = vpop.f32.mrf.mxu3 }
 0x334   : > { %vm1139_vm1 = vcmp.gt.f32.partialorder %v1097_v31, 0.0  ;;  %v1171_v42 = vmul.f32 0.01, %v1097_v31 }
 0x336   : > { %v1203_v22 = vsel %vm1139_vm1, %v1097_v31, %v1171_v42 }
 0x337   : > { %1786 = vmatmul.msk.f32.gmra.mxu2 %vm1211_vm5, %v1203_v22 }
 0x33a   : > { %v1362_v10 = vpop.f32.mrf.mxu2 }
 0x33b   : > { %v1100_v62 = vpop.f32.mrf.mxu3 }
 0x33c   : > { %vm1140_vm2 = vcmp.gt.f32.partialorder %v1100_v62, 0.0  ;;  %v1172_v35 = vmul.f32 0.01, %v1100_v62 }
 0x33e   : > { %v1204_v15 = vsel %vm1140_vm2, %v1100_v62, %v1172_v35 }
 0x33f   : > { %1787 = vmatmul.msk.f32.gmra.mxu2 %vm1211_vm5, %v1204_v15 }
 0x342   : > { %v1365_v25 = vpop.f32.mrf.mxu2 }
 0x343   : > { %v1103_v61 = vpop.f32.mrf.mxu3 }
 0x344   : > { %vm1141_vm3 = vcmp.gt.f32.partialorder %v1103_v61, 0.0  ;;  %v1173_v21 = vmul.f32 0.01, %v1103_v61 }
 0x346   : > { %v1205_v11 = vsel %vm1141_vm3, %v1103_v61, %v1173_v21  ;;  %v1437_v61 = vadd.f32 %v1365_v25, %v2574_v8  ;;  %v1434_v8 = vadd.f32 %v2765_v36, %v2553_v24  ;;  %v1431_v36 = vadd.f32 %v2756_v30, %v2530_v34 }
 0x347   : > { %1788 = vmatmul.msk.f32.gmra.mxu2 %vm1211_vm5, %v1205_v11  ;;  %v1428_v34 = vadd.f32 %v2747_v23, %v2505_v7  ;;  %v1425_v23 = vadd.f32 %v2738_v58, %v2484_v45 }
 0x348   : > { %vm1469_vm9 = vcmp.gt.f32.partialorder %v1437_v61, 0.0  ;;  %vm1466_vm12 = vcmp.gt.f32.partialorder %v1434_v8, 0.0  ;;  %vm1463_vm15 = vcmp.gt.f32.partialorder %v1431_v36, 0.0 }
 0x349   : > { %vm1460_vm2 = vcmp.gt.f32.partialorder %v1428_v34, 0.0 }
 0x34a   : > { %v1368_v26 = vpop.f32.mrf.mxu2 }
 0x34b   : > { %v1106_v32 = vpop.f32.mrf.mxu3  ;;  %v1438_v22 = vadd.f32 %v1368_v26, %v2582_v46  ;;  %v1435_v46 = vadd.f32 %v1359_v33, %v2561_v41  ;;  %v1432_v41 = vadd.f32 %v2759_v37, %v2537_v60  ;;  %v1429_v37 = vadd.f32 %v2750_v56, %v2512_v16 }
 0x34c   : > { %vm1142_vm4 = vcmp.gt.f32.partialorder %v1106_v32, 0.0  ;;  %v1174_v51 = vmul.f32 0.01, %v1106_v32  ;;  %v1426_v16 = vadd.f32 %v2741_v54, %v2491_v57 }
 0x34d   : > { %v1502_v21 = vmul.f32 0.01, %v1438_v22  ;;  %v1499_v25 = vmul.f32 0.01, %v1435_v46  ;;  %vm1467_vm11 = vcmp.gt.f32.partialorder %v1435_v46, 0.0  ;;  %vm1464_vm14 = vcmp.gt.f32.partialorder %v1432_v41, 0.0 }
 0x34e   : > { %v1206_v63 = vsel %vm1142_vm4, %v1106_v32, %v1174_v51  ;;  %v1501_v32 = vmul.f32 0.01, %v1437_v61  ;;  %vm1461_vm1 = vcmp.gt.f32.partialorder %v1429_v37, 0.0  ;;  %vm1458_vm4 = vcmp.gt.f32.partialorder %v1426_v16, 0.0 }
 0x34f   : > { %1789 = vmatmul.msk.f32.gmra.mxu2 %vm1211_vm5, %v1206_v63 }
 0x350   : > { %v1533_v63 = vsel %vm1469_vm9, %v1437_v61, %v1501_v32  ;;  %v1492_v61 = vmul.f32 0.01, %v1428_v34 }
 0x352   : > { %v1371_v43 = vpop.f32.mrf.mxu2  ;;  %v1524_v56 = vsel %vm1460_vm2, %v1428_v34, %v1492_v61  ;;  %v1554_v61 = vld [vmem:[%s2899_s5] sm:$0x3] }
 0x353   : > { %v1109_v29 = vpop.f32.mrf.mxu3  ;;  %v1439_v18 = vadd.f32 %v1371_v43, %v2597_v28  ;;  %v1436_v28 = vadd.f32 %v1362_v10, %v2570_v17  ;;  %v1433_v10 = vadd.f32 %v2762_v53, %v2545_v6  ;;  %v1430_v6 = vadd.f32 %v2753_v3, %v2521_v40 }
 0x354   : > { %vm1143_vm6 = vcmp.gt.f32.partialorder %v1109_v29, 0.0  ;;  %v1175_v2 = vmul.f32 0.01, %v1109_v29  ;;  %v1427_v3 = vadd.f32 %v2744_v49, %v2498_v1  ;;  %v1489_v49 = vmul.f32 0.01, %v1425_v23 }
 0x355   : > { %v1503_v62 = vmul.f32 0.01, %v1439_v18  ;;  %vm1471_vm8 = vcmp.gt.f32.partialorder %v1439_v18, 0.0  ;;  %v1500_v26 = vmul.f32 0.01, %v1436_v28  ;;  %vm1468_vm10 = vcmp.gt.f32.partialorder %v1436_v28, 0.0 }
 0x356   : > { %v1207_v4 = vsel %vm1143_vm6, %v1109_v29, %v1175_v2  ;;  %v1498_v29 = vmul.f32 0.01, %v1434_v8  ;;  %v1531_v2 = vsel %vm1467_vm11, %v1435_v46, %v1499_v25  ;;  %v1497_v33 = vmul.f32 0.01, %v1433_v10 }
 0x357   : > { %1790 = vmatmul.msk.f32.gmra.mxu2 %vm1211_vm5, %v1207_v4  ;;  %v1535_v11 = vsel %vm1471_vm8, %v1439_v18, %v1503_v62  ;;  %vm1470_vm5 = vcmp.gt.f32.partialorder %v1438_v22, 0.0  ;;  %v1532_v43 = vsel %vm1468_vm10, %v1436_v28, %v1500_v26  ;;  %vm1465_vm13 = vcmp.gt.f32.partialorder %v1433_v10, 0.0 }
 0x358   : > { %v1530_v4 = vsel %vm1466_vm12, %v1434_v8, %v1498_v29  ;;  %v1496_v18 = vmul.f32 0.01, %v1432_v41  ;;  %vm1462_vm0 = vcmp.gt.f32.partialorder %v1430_v6, 0.0  ;;  %v1493_v62 = vmul.f32 0.01, %v1429_v37 }
 0x359   : > { %vm1459_vm3 = vcmp.gt.f32.partialorder %v1427_v3, 0.0  ;;  %v1490_v28 = vmul.f32 0.01, %v1426_v16  ;;  %vm1457_vm6 = vcmp.gt.f32.partialorder %v1425_v23, 0.0 }
 0x35a   : > { %v1374_v48 = vpop.f32.mrf.mxu2  ;;  %v1528_v53 = vsel %vm1464_vm14, %v1432_v41, %v1496_v18 }
 0x35b   : > { %v1440_v31 = vadd.f32 %v1374_v48, %v2605_v50  ;;  %v1534_v50 = vsel %vm1470_vm5, %v1438_v22, %v1502_v21  ;;  %v1529_v48 = vsel %vm1465_vm13, %v1433_v10, %v1497_v33  ;;  %v1494_v22 = vmul.f32 0.01, %v1430_v6 }
 0x35c   : > { %v1491_v21 = vmul.f32 0.01, %v1427_v3  ;;  %v1522_v1 = vsel %vm1458_vm4, %v1426_v16, %v1490_v28 }
 0x35d   : > { %vm1472_vm7 = vcmp.gt.f32.partialorder %v1440_v31, 0.0  ;;  %v1504_v42 = vmul.f32 0.01, %v1440_v31  ;;  %v1526_v30 = vsel %vm1462_vm0, %v1430_v6, %v1494_v22 }
 0x35f   : > { %v1536_v35 = vsel %vm1472_vm7, %v1440_v31, %v1504_v42  ;;  %v1495_v31 = vmul.f32 0.01, %v1431_v36 }
 0x360   : > { %1560 = vmatpush.xpose.msra.mxu0 %v1536_v35  ;;  %v1525_v35 = vsel %vm1461_vm1, %v1429_v37, %v1493_v62 }
 0x361   : > { %v1527_v42 = vsel %vm1463_vm15, %v1431_v36, %v1495_v31 }
 0x362   : > { %v2776_v15 = vpop.f32.mrf.mxu2 }
 0x364   : > { %1561 = vmatpush.xpose.msra.mxu0 %v1535_v11  ;;  %v1523_v11 = vsel %vm1459_vm3, %v1427_v3, %v1491_v21 }
 0x368   : > { %1562 = vmatpush.xpose.msra.mxu0 %v1534_v50  ;;  %v1521_v50 = vsel %vm1457_vm6, %v1425_v23, %v1489_v49 }
 0x36a   : > { %v2780_v51 = vpop.f32.mrf.mxu2 }
 0x36c   : > { %1563 = vmatpush.xpose.msra.mxu0 %v1533_v63 }
 0x370   : > { %1564 = vmatpush.xpose.msra.mxu0 %v1532_v43 }
 0x372   : > { %v2785_v17 = vpop.f32.mrf.mxu2 }
 0x373   : > { %v1443_v23 = vadd.f32 %v2785_v17, %v2627_v44 }
 0x374   : > { %1565 = vmatpush.xpose.msra.mxu0 %v1531_v2 }
 0x375   : > { %vm1475_vm3 = vcmp.gt.f32.partialorder %v1443_v23, 0.0 }
 0x378   : > { %1566 = vmatpush.xpose.msra.mxu0 %v1530_v4 }
 0x37a   : > { %v2791_v24 = vpop.f32.mrf.mxu2 }
 0x37c   : > { %1567 = vmatpush.xpose.msra.mxu0 %v1529_v48 }
 0x380   : > { %1568 = vmatpush.xpose.msra.mxu0 %v1528_v53 }
 0x382   : > { %v2797_v60 = vpop.f32.mrf.mxu2 }
 0x383   : > { %v1445_v16 = vadd.f32 %v2797_v60, %v2641_v9  ;;  %v1442_v9 = vadd.f32 %v2780_v51, %v2621_v55  ;;  %v1507_v60 = vmul.f32 0.01, %v1443_v23 }
 0x384   : > { %1569 = vmatpush.xpose.msra.mxu0 %v1527_v42 }
 0x385   : > { %vm1477_vm1 = vcmp.gt.f32.partialorder %v1445_v16, 0.0  ;;  %v1539_v49 = vsel %vm1475_vm3, %v1443_v23, %v1507_v60  ;;  %vm1474_vm4 = vcmp.gt.f32.partialorder %v1442_v9, 0.0 }
 0x388   : > { %1570 = vmatpush.xpose.msra.mxu0 %v1526_v30 }
 0x38a   : > { %v2803_v40 = vpop.f32.mrf.mxu2 }
 0x38b   : > { %v1446_v3 = vadd.f32 %v2803_v40, %v2648_v38  ;;  %v1444_v38 = vadd.f32 %v2791_v24, %v2634_v5  ;;  %v1509_v40 = vmul.f32 0.01, %v1445_v16  ;;  %v1441_v5 = vadd.f32 %v2776_v15, %v2613_v20 }
 0x38c   : > { %1571 = vmatpush.xpose.msra.mxu0 %v1525_v35  ;;  %v1506_v24 = vmul.f32 0.01, %v1442_v9 }
 0x38d   : > { %vm1478_vm0 = vcmp.gt.f32.partialorder %v1446_v3, 0.0  ;;  %v1541_v28 = vsel %vm1477_vm1, %v1445_v16, %v1509_v40  ;;  %vm1476_vm2 = vcmp.gt.f32.partialorder %v1444_v38, 0.0  ;;  %v1505_v44 = vmul.f32 0.01, %v1441_v5 }
 0x38e   : > { %v1538_v17 = vsel %vm1474_vm4, %v1442_v9, %v1506_v24  ;;  %vm1473_vm6 = vcmp.gt.f32.partialorder %v1441_v5, 0.0 }
 0x390   : > { %1572 = vmatpush.xpose.msra.mxu0 %v1524_v56  ;;  %v1510_v56 = vmul.f32 0.01, %v1446_v3 }
 0x392   : > { %v1395_v7 = vpop.f32.mrf.mxu2 }
 0x393   : > { %v1447_v30 = vadd.f32 %v1395_v7, %v2656_v19  ;;  %v2054_v19 = vmov 0   ;;  %v1542_v7 = vsel %vm1478_vm0, %v1446_v3, %v1510_v56 }
 0x394   : > { %1573 = vmatpush.xpose.msra.mxu0 %v1523_v11  ;;  %1895 = vset.pattern.permute.xlu0 %v2054_v19  ;;  %v1508_v11 = vmul.f32 0.01, %v1444_v38 }
 0x395   : > { %v1511_v35 = vmul.f32 0.01, %v1447_v30  ;;  %vm1479_vm15 = vcmp.gt.f32.partialorder %v1447_v30, 0.0  ;;  %1557 = vperm.xlu0 %1895, %v1554_v61  }
 0x397   : > { %v1543_v21 = vsel %vm1479_vm15, %v1447_v30, %v1511_v35 }
 0x398   : > { %1574 = vmatpush.xpose.msra.mxu0 %v1522_v1  ;;  %v1540_v1 = vsel %vm1476_vm2, %v1444_v38, %v1508_v11 }
 0x39a   : > { %v1398_v32 = vpop.f32.mrf.mxu2 }
 0x39b   : > { %v1448_v22 = vadd.f32 %v1398_v32, %v2664_v39  ;;  %v1537_v32 = vsel %vm1473_vm6, %v1441_v5, %v1505_v44 }
 0x39c   : > { %1575 = vmatpush.xpose.msra.mxu0 %v1521_v50 }
 0x39d   : > { %v1512_v62 = vmul.f32 0.01, %v1448_v22  ;;  %vm1480_vm14 = vcmp.gt.f32.partialorder %v1448_v22, 0.0 }
 0x39f   : > { %v1544_v39 = vsel %vm1480_vm14, %v1448_v22, %v1512_v62 }
 0x3a2   : > { %v1401_v57 = vpop.f32.mrf.mxu2 }
 0x3a3   : > { %v1449_v37 = vadd.f32 %v1401_v57, %v2672_v59  ;;  %v1553_v59 = vld [vmem:[%s2898_s4] sm:$0x3] }
 0x3a4   : > { %1576 = vmatmul.f32.vlgmr.msra.gmra.mxu0 %v1553_v59 }
 0x3a5   : > { %v1513_v34 = vmul.f32 0.01, %v1449_v37  ;;  %vm1481_vm13 = vcmp.gt.f32.partialorder %v1449_v37, 0.0 }
 0x3aa   : > { %v1404_v54 = vpop.f32.mrf.mxu2 }
 0x3ab   : > { %v1450_v53 = vadd.f32 %v1404_v54, %v2680_v0  ;;  %v1545_v0 = vsel %vm1481_vm13, %v1449_v37, %v1513_v34 }
 0x3ad   : > { %v1514_v42 = vmul.f32 0.01, %v1450_v53  ;;  %vm1482_vm12 = vcmp.gt.f32.partialorder %v1450_v53, 0.0 }
 0x3b2   : > { %v1407_v46 = vpop.f32.mrf.mxu2 }
 0x3ba   : > { %v1410_v26 = vpop.f32.mrf.mxu2 }
 0x3bb   : > { %v1452_v48 = vadd.f32 %v1410_v26, %v2696_v13 }
 0x3bd   : > { %v1516_v6 = vmul.f32 0.01, %v1452_v48  ;;  %vm1484_vm10 = vcmp.gt.f32.partialorder %v1452_v48, 0.0 }
 0x3c2   : > { %v1413_v63 = vpop.f32.mrf.mxu2 }
 0x3c3   : > { %v1453_v33 = vadd.f32 %v1413_v63, %v2704_v52  ;;  %v1548_v52 = vsel %vm1484_vm10, %v1452_v48, %v1516_v6 }
 0x3c5   : > { %v1517_v18 = vmul.f32 0.01, %v1453_v33  ;;  %vm1485_vm9 = vcmp.gt.f32.partialorder %v1453_v33, 0.0 }
 0x3ca   : > { %v1416_v8 = vpop.f32.mrf.mxu2 }
 0x3cb   : > { %v1454_v29 = vadd.f32 %v1416_v8, %v2712_v47  ;;  %v1549_v47 = vsel %vm1485_vm9, %v1453_v33, %v1517_v18 }
 0x3cd   : > { %v1518_v4 = vmul.f32 0.01, %v1454_v29  ;;  %vm1486_vm5 = vcmp.gt.f32.partialorder %v1454_v29, 0.0 }
 0x3d2   : > { %v1419_v25 = vpop.f32.mrf.mxu2 }
 0x3d3   : > { %v1455_v45 = vadd.f32 %v1419_v25, %v2720_v12  ;;  %v1550_v12 = vsel %vm1486_vm5, %v1454_v29, %v1518_v4 }
 0x3d5   : > { %v1519_v2 = vmul.f32 0.01, %v1455_v45  ;;  %vm1487_vm8 = vcmp.gt.f32.partialorder %v1455_v45, 0.0 }
 0x3d7   : > { %v1551_v36 = vsel %vm1487_vm8, %v1455_v45, %v1519_v2 }
 0x3da   : > { %v1422_v43 = vpop.f32.mrf.mxu2 }
 0x3db   : > { %v1456_v58 = vadd.f32 %v1422_v43, %v2728_v27  ;;  %v1451_v27 = vadd.f32 %v1407_v46, %v2688_v14  ;;  %v1546_v14 = vsel %vm1482_vm12, %v1450_v53, %v1514_v42 }
 0x3dd   : > { %vm1488_vm7 = vcmp.gt.f32.partialorder %v1456_v58, 0.0  ;;  %v1520_v10 = vmul.f32 0.01, %v1456_v58  ;;  %v1515_v31 = vmul.f32 0.01, %v1451_v27  ;;  %vm1483_vm11 = vcmp.gt.f32.partialorder %v1451_v27, 0.0 }
 0x3df   : > { %v1552_v41 = vsel %vm1488_vm7, %v1456_v58, %v1520_v10  ;;  %v1547_v13 = vsel %vm1483_vm11, %v1451_v27, %v1515_v31  ;;  %vm1603_vm7 = vcmask 1041408  }
 0x3e0   : > { %1580 = vmatpush.xpose.msra.mxu1 %v1552_v41 }
 0x3e4   : > { %1581 = vmatpush.xpose.msra.mxu1 %v1551_v36 }
 0x3e8   : > { %1582 = vmatpush.xpose.msra.mxu1 %v1550_v12 }
 0x3ec   : > { %1583 = vmatpush.xpose.msra.mxu1 %v1549_v47 }
 0x3f0   : > { %1584 = vmatpush.xpose.msra.mxu1 %v1548_v52 }
 0x3f4   : > { %1585 = vmatpush.xpose.msra.mxu1 %v1547_v13 }
 0x3f8   : > { %1586 = vmatpush.xpose.msra.mxu1 %v1546_v14 }
 0x3fc   : > { %1587 = vmatpush.xpose.msra.mxu1 %v1545_v0 }
 0x400   : > { %1588 = vmatpush.xpose.msra.mxu1 %v1544_v39 }
 0x404   : > { %1589 = vmatpush.xpose.msra.mxu1 %v1543_v21 }
 0x407   : > { %v1558_v55 = vpop.permute.xlu0 %1557 }
 0x408   : > { %1590 = vmatpush.xpose.msra.mxu1 %v1542_v7 }
 0x40c   : > { %1591 = vmatpush.xpose.msra.mxu1 %v1541_v28 }
 0x410   : > { %1592 = vmatpush.xpose.msra.mxu1 %v1540_v1 }
 0x414   : > { %1593 = vmatpush.xpose.msra.mxu1 %v1539_v49 }
 0x418   : > { %1594 = vmatpush.xpose.msra.mxu1 %v1538_v17 }
 0x41c   : > { %1595 = vmatpush.xpose.msra.mxu1 %v1537_v32 }
 0x41f   : > { %1596 = vmatmul.f32.vlgmr.msra.gmra.mxu1 %v1553_v59 }
 0x421   : > { %v1577_v50 = vpop.f32.mrf.mxu0 }
 0x422   : > { %v1578_v20 = vadd.f32 %v1577_v50, %v1558_v55 }
 0x49c   : > { %v1597_v51 = vpop.f32.mrf.mxu1 }
 0x49d   : > { %v1598_v57 = vadd.f32 %v1597_v51, %v1558_v55 }
 0x49e   : > { %1614 = sbr.rel (!%p2143_p11) target bundleno = 1217 (0x4c1), region = 56 }
 0x49f   : > { %v1602_v54 = vrot.slane %v1598_v57, 6 }
 0x4a1   : > { %v1604_v15 = vsel %vm1603_vm7, %v1578_v20, %v1602_v54 }
 0x4a2   : > { %1606 = vst [vmem:[%s297_s16] sm:$0xf] %v1604_v15 }
 0x4a3   : > { %s2934_s29 = smov (!%p1617_p6, %s1616_s29), 2 }
 0x4a4   : > { %s1793_s30 = sshll.u32 %s2934_s29, 1 }
 0x4a5   : > { %s1620_s15 = ssub.s32 4, %s1793_s30 }
 0x4a6   : > { %s1621_s28 = sshll.u32 %s1620_s15, 4 }
 0x4a7   : > { %1622 = vsyncadd %s1608_s20, %s1621_s28  ;;  %p2849_p13 = scmp.ne.s32.totalorder %s1793_s30, 0  ;;  %s1800_s9 = sshll.u32 %s2112_s25, 2 }
 0x4a8   : > { %s1625_s7 = scalar_lea.hbm %s2900_s6, %s1800_s9  ;;  %s1797_s18 = sshll.u32 %s2934_s29, 5 }
 0x4a9   : > { %s1628_s26 = sshll.u32 %s297_s16, 4  ;;  %s1630_s19 = sshll.u32 %s1625_s7, 4  ;;  %s1629_s26 = int_to_ptr.vmem [resolvable:$true] %s1628_s26  ;;  %s1631_s19 = int_to_ptr.hbm [resolvable:$true] %s1630_s19 }
 0x4aa   : > { %s1965_s13 = sshra.s32 %s1629_s26, 4  ;;  %s1967_s12 = sshrl.u32 %s1797_s18, 4  ;;  %s1966_s13 = int_to_ptr.vmem [resolvable:$true] %s1965_s13 }
 0x4ab   : > { %s1972_s1 = scalar_lea.vmem %s1966_s13, %s1967_s12  ;;  %s2055_s17 = smov [#allocation7]  }
 0x4ac   : > { %p1973_p11 = scmp.ne.s32.totalorder %s1966_s13, %s1972_s1  ;;  %s1976_s25 = scalar_lea.vmem %s2055_s17, 8 }
 0x4ad   : > { %p1978_p10 = scmp.lt.s32.totalorder %s1976_s25, %s1972_s1 }
 0x4ae   : > { %p1974_p2 = pnand %p1973_p11, %p2849_p13 }
 0x4b0   : > { %p1975_p7 = pneg %p1974_p2 }
 0x4b2   : > { %p1980_p1 = pnand %p1978_p10, %p1975_p7 }
 0x4b4   : > { %1983 = shalt.err (!%p1980_p1)
}
 0x4b5   : > { %s1984_s30 = sshra.s32 %s1631_s19, 4  ;;  %s1995_s9 = scalar_lea.hbm %s2900_s6, 6  ;;  %s1985_s30 = int_to_ptr.hbm [resolvable:$true] %s1984_s30 }
 0x4b6   : > { %s1991_s16 = scalar_lea.hbm %s1985_s30, %s1967_s12  ;;  %p1996_p8 = scmp.lt.s32.totalorder %s1985_s30, %s2900_s6 }
 0x4b7   : > { %p1992_p0 = scmp.ne.s32.totalorder %s1985_s30, %s1991_s16  ;;  %p1997_p9 = scmp.lt.s32.totalorder %s1995_s9, %s1991_s16 }
 0x4b9   : > { %p1993_p3 = pnand %p1992_p0, %p2849_p13  ;;  %p1998_p4 = por %p1997_p9, %p1996_p8 }
 0x4bb   : > { %p1994_p5 = pneg %p1993_p3 }
 0x4bd   : > { %p1999_p12 = pnand %p1998_p4, %p1994_p5 }
 0x4bf   : > { %2002 = shalt.err (!%p1999_p12)
}
 0x4c0   : > { %1633 = dma.vmem_to_hbm [thread:$0]  (%p2849_p13), %s1629_s26, %s1797_s18, %s1631_s19, %s1608_s20  }
 0x4c1 PF: > { %s1642_s7 = sand.u32 1, %s2034_s21   ;;  %p2922_p6 = scmp.ne.s32.totalorder %s2912_s10, 0 }
 0x4c2   : > { %p2923_p11 = scmp.ge.s32.totalorder %s2046_s24, 2  ;;  %s1643_s13 = scalar_lea.sflag [#allocation4], %s1642_s7 }
 0x4c4   : > { %p1851_p2 = pnand %p2923_p11, %p2922_p6 }
 0x4c6   : > { %p1852_p7 = pneg %p1851_p2 }
 0x4c8   : > { %2029 = dma.done.wait (%p1852_p7), %s1643_s13, 64  }
 0x4c9   : > { %2031 = vsyncadd (%p1852_p7), %s1643_s13, 4294967232  ;;  %s2924_s8 = sld [smem:[#allocation11_spill]]  ;;  %p20_p10 = scmp.ge.s32.totalorder %s2116_s27, 4  }
 0x4ca   : > { %s2925_s23 = sld [smem:[#allocation12_spill]]  ;;  %s2926_s21 = smov %s2038_s22 }
 0x4cb   : > { %s2928_s24 = smov %s2116_s27  ;;  %22 = sbr.rel (!%p20_p10) target bundleno = 8 (0x8), region = 93 }
 0x4cf   : > { %s2927_s22 = smov %s2924_s8 }
 0x4d0   :  { %1649 = vsyncpa [#allocation3], 1 }
 0x4d1   :  { %1651 = vsyncpa [#allocation3 + $0x1], 1 }
 0x4d2   :  { %1652 = vsyncpa [#allocation6], 1 }
 0x4d3   :  { %1653 = vsyncpa [#allocation4], 1 }
 0x4d4   :  { %1655 = vsyncpa [#allocation4 + $0x1], 1 }

</bundles_post_ra>
